<compile_context>
chip_gen: v7x
topology: tpu7x:2x2x1
jax: 0.10.0
libtpu: 0.0.40
codegen_flags: <defaults>
</compile_context>

<pallas_src>
import functools

import jax
import jax.numpy as jnp
from jax.experimental import pallas as pl
from jax.experimental.pallas import tpu as pltpu

# Keep the pure-JAX f32 reference genuinely f32 so the strict check is meaningful.
jax.config.update("jax_default_matmul_precision", "highest")

LN_EPS = 1e-5  # torch.nn.LayerNorm default


# --------------------------------- kernel ------------------------------------

def transformer_encoder_kernel(x_ref, pe_ref,
                               wqkv_ref, bqkv_ref, wo_ref, bo_ref, g1_ref, be1_ref,
                               w1_ref, b1_ref, w2_ref, b2_ref, g2_ref, be2_ref,
                               o_ref,
                               *, num_heads, dim_q, dim_k, matmul_dtype, approx_softmax_recip):
    layer = pl.program_id(1)
    NB, T, D = o_ref.shape
    R = NB * T
    HQ = num_heads * dim_q
    HK = num_heads * dim_k

    def mm(a, b):
        # Wide matmuls; bf16 operands with f32 accumulation on the production path.
        if a.dtype != matmul_dtype:
            a = a.astype(matmul_dtype)
        if b.dtype != matmul_dtype:
            b = b.astype(matmul_dtype)
        return jnp.dot(a, b, preferred_element_type=jnp.float32)

    def layernorm(y, gamma, beta):
        # One-pass variance: E[y^2] - mu^2 (saves a full elementwise pass per LN).
        mu = jnp.mean(y, axis=-1, keepdims=True)
        ms = jnp.mean(y * y, axis=-1, keepdims=True)
        var = jnp.maximum(ms - mu * mu, 0.0)
        return (y - mu) * jax.lax.rsqrt(var + LN_EPS) * gamma + beta

    def erf(v):
        # Abramowitz & Stegun 7.1.26 (max abs err ~1.5e-7); exp/divide map to the EUP.
        a1, a2, a3, a4, a5 = 0.254829592, -0.284496736, 1.421413741, -1.453152027, 1.061405429
        p = 0.3275911
        s = jnp.where(v >= 0.0, 1.0, -1.0)
        av = jnp.abs(v)
        t = 1.0 / (1.0 + p * av)
        poly = ((((a5 * t + a4) * t + a3) * t + a2) * t + a1) * t
        return s * (1.0 - poly * jnp.exp(-av * av))

    def gelu(v):
        # torch.nn.GELU() default (erf-based, "exact").
        return 0.5 * v * (1.0 + erf(v * 0.7071067811865476))

    # ---- layer 0: fuse the position-encoding add.  The output block's index map is
    # constant along the layer axis, so this VMEM buffer is the layer-resident
    # activation for all subsequent layers (no scratch, no final copy). ----
    @pl.when(layer == 0)
    def _():
        o_ref[...] = x_ref[...] + pe_ref[...]

    x = o_ref[...].reshape(R, D)

    # ---- fused QKV projection: all heads folded along the lane axis, one wide matmul ----
    qkv = mm(x, wqkv_ref[0]) + bqkv_ref[0]                     # (R, HQ + 2*HK), f32
    q = qkv[:, :HQ].reshape(NB, T, HQ)
    k = qkv[:, HQ:HQ + HK].reshape(NB, T, HK)
    v = qkv[:, HQ + HK:].reshape(NB, T, HK)

    # ---- per-head scaled dot-product attention (batched over NB via einsum).
    # Head outputs stay in registers and are concatenated into one lane-dense slab. ----
    inv_scale = 1.0 / (float(dim_q) ** 0.5)                    # root_dk = sqrt(dim_q)
    head_outs = []
    for h in range(num_heads):
        q_h = q[:, :, h * dim_q:(h + 1) * dim_q]
        k_h = k[:, :, h * dim_k:(h + 1) * dim_k]
        v_h = v[:, :, h * dim_k:(h + 1) * dim_k]
        s = jnp.einsum("bqd,bkd->bqk", q_h, k_h,
                       preferred_element_type=jnp.float32) * inv_scale
        s = s - jnp.max(s, axis=-1, keepdims=True)
        p = jnp.exp(s)
        denom = jnp.sum(p, axis=-1, keepdims=True)
        # approx reciprocal (EUP slot) only on the low-precision production path
        p = p * pl.reciprocal(denom, approx=approx_softmax_recip)
        o_h = jnp.einsum("bqk,bkd->bqd", p, v_h, preferred_element_type=jnp.float32)
        head_outs.append(o_h.reshape(R, dim_k))
    heads = jnp.concatenate(head_outs, axis=-1)                # (R, H*dk), lane-dense

    # ---- single output projection over the concatenated heads ----
    attn = mm(heads, wo_ref[0]) + bo_ref[0]                    # (R, D)

    # ---- Residual_AT: x + LayerNorm(MHA(x)) ----
    x1 = x + layernorm(attn, g1_ref[0], be1_ref[0])

    # ---- Feed-forward: Linear -> GELU(exact) -> Linear ----
    h1 = gelu(mm(x1, w1_ref[0]) + b1_ref[0])
    ff = mm(h1, w2_ref[0]) + b2_ref[0]

    # ---- Residual_FF; activation stays resident in o_ref for the next layer ----
    y = x1 + layernorm(ff, g2_ref[0], be2_ref[0])
    o_ref[...] = y.reshape(NB, T, D)


# --------------------------------- wrapper -----------------------------------

def position_encoding(T, D):
    pos = jnp.arange(T, dtype=jnp.float32).reshape(1, T, 1)
    dim = jnp.arange(D, dtype=jnp.float32).reshape(1, 1, D)
    phase = pos / (10000.0 ** jnp.floor(dim / float(D)))
    return jnp.where((dim.astype(jnp.int32) % 2) == 0, jnp.sin(phase), jnp.cos(phase))


def transformer_encoder(x, params, *, num_heads, dim_q, dim_k,
                        batch_block=None, matmul_dtype=jnp.bfloat16,
                        approx_softmax_recip=None):
    if x.ndim == 2:
        x = x.reshape(1, *x.shape)
    x = x.astype(jnp.float32)
    N, T, D = x.shape
    L = params["wqkv"].shape[0]
    assert dim_q == dim_k, "scores require dim_q == dim_k (as in the PyTorch bmm)"

    # Default batch tiling: split the batch so the 'parallel' grid axis has >= 2
    # programs (feeds both v7x TensorCores) whenever possible.
    if batch_block is None:
        batch_block = N // 2 if (N % 2 == 0 and N >= 2) else N
    NB = batch_block
    assert N % NB == 0

    if approx_softmax_recip is None:
        approx_softmax_recip = jnp.dtype(matmul_dtype) != jnp.dtype(jnp.float32)

    pe = position_encoding(T, D)                               # (1, T, D) f32

    # Store the matmul weights in HBM in the matmul dtype (bf16 on the production
    # path): halves the per-layer weight DMA bytes and the double-buffered VMEM.
    wqkv = params["wqkv"].astype(matmul_dtype)
    wo = params["wo"].astype(matmul_dtype)
    w1 = params["w1"].astype(matmul_dtype)
    w2 = params["w2"].astype(matmul_dtype)

    operands = [x, pe,
                wqkv, params["bqkv"], wo, params["bo"], params["g1"], params["be1"],
                w1, params["b1"], w2, params["b2"], params["g2"], params["be2"]]

    def layer_spec(shape):
        nt = len(shape) - 1
        return pl.BlockSpec((1,) + tuple(shape[1:]),
                            lambda b, l, _nt=nt: (l,) + (0,) * _nt)

    in_specs = [pl.BlockSpec((NB, T, D), lambda b, l: (b, 0, 0)),   # x (read at l==0)
                pl.BlockSpec((1, T, D), lambda b, l: (0, 0, 0))]    # positional encoding
    in_specs += [layer_spec(a.shape) for a in operands[2:]]

    # Scoped-VMEM budget: double-buffered per-layer weight blocks + activation/PE/out
    # blocks + slack.  (v5e default scoped limit is 16 MiB; v6e 32 MiB.)
    weight_block_bytes = sum((a.size // a.shape[0]) * a.dtype.itemsize for a in operands[2:])
    act_bytes = (2 * NB * T * D + T * D) * 4
    vmem_limit = int(min(128 * 1024 * 1024,
                         max(32 * 1024 * 1024,
                             2 * (weight_block_bytes + act_bytes) + 16 * 1024 * 1024)))

    kernel = functools.partial(transformer_encoder_kernel,
                               num_heads=num_heads, dim_q=dim_q, dim_k=dim_k,
                               matmul_dtype=matmul_dtype,
                               approx_softmax_recip=bool(approx_softmax_recip))

    return pl.pallas_call(
        kernel,
        out_shape=jax.ShapeDtypeStruct((N, T, D), jnp.float32),
        grid_spec=pltpu.PrefetchScalarGridSpec(
            num_scalar_prefetch=0,
            grid=(N // NB, L),                                 # layers innermost
            in_specs=in_specs,
            out_specs=pl.BlockSpec((NB, T, D), lambda b, l: (b, 0, 0)),
        ),
        compiler_params=pltpu.CompilerParams(
            dimension_semantics=("parallel", "arbitrary"),
            vmem_limit_bytes=vmem_limit),
    )(*operands)


# ------------------------ deterministic parameter init -----------------------

def init_params(key, num_layers, num_heads, dim_model, dim_ff, dim_q, dim_k):
    D, F, H, L = dim_model, dim_ff, num_heads, num_layers
    qkv_out = H * dim_q + 2 * H * dim_k
    ks = jax.random.split(key, 8)

    def lin(k, fan_in, shape):   # torch.nn.Linear default: U(-1/sqrt(fan_in), +1/sqrt(fan_in))
        b = 1.0 / (fan_in ** 0.5)
        return jax.random.uniform(k, shape, jnp.float32, -b, b)

    return dict(
        wqkv=lin(ks[0], D, (L, D, qkv_out)),          # [Q heads | K heads | V heads]
        bqkv=lin(ks[1], D, (L, 1, qkv_out)),
        wo=lin(ks[2], H * dim_k, (L, H * dim_k, D)),
        bo=lin(ks[3], H * dim_k, (L, 1, D)),
        g1=jnp.ones((L, 1, D), jnp.float32),
        be1=jnp.zeros((L, 1, D), jnp.float32),
        w1=lin(ks[4], D, (L, D, F)),
        b1=lin(ks[5], D, (L, 1, F)),
        w2=lin(ks[6], F, (L, F, D)),
        b2=lin(ks[7], F, (L, 1, D)),
        g2=jnp.ones((L, 1, D), jnp.float32),
        be2=jnp.zeros((L, 1, D), jnp.float32),
    )


# ------------------------------ pure-JAX reference ----------------------------

def _ln_ref(y, g, b):
    mu = y.mean(-1, keepdims=True)
    var = ((y - mu) ** 2).mean(-1, keepdims=True)
    return (y - mu) / jnp.sqrt(var + LN_EPS) * g + b


def _ref_encoder(x, params, num_heads, dim_q, dim_k):
    if x.ndim == 2:
        x = x[None]
    _, T, D = x.shape
    y = x + position_encoding(T, D)
    L = params["wqkv"].shape[0]
    HQ, HK = num_heads * dim_q, num_heads * dim_k
    for l in range(L):
        qkv = y @ params["wqkv"][l] + params["bqkv"][l]
        q, k, v = qkv[..., :HQ], qkv[..., HQ:HQ + HK], qkv[..., HQ + HK:]
        heads = []
        for h in range(num_heads):
            q_h = q[..., h * dim_q:(h + 1) * dim_q]
            k_h = k[..., h * dim_k:(h + 1) * dim_k]
            v_h = v[..., h * dim_k:(h + 1) * dim_k]
            s = jnp.einsum("ntd,nsd->nts", q_h, k_h) / (float(dim_q) ** 0.5)
            heads.append(jnp.einsum("nts,nsd->ntd", jax.nn.softmax(s, axis=-1), v_h))
        attn = jnp.concatenate(heads, -1) @ params["wo"][l] + params["bo"][l]
        x1 = y + _ln_ref(attn, params["g1"][l], params["be1"][l])
        h1 = jax.nn.gelu(x1 @ params["w1"][l] + params["b1"][l], approximate=False)
        ff = h1 @ params["w2"][l] + params["b2"][l]
        y = x1 + _ln_ref(ff, params["g2"][l], params["be2"][l])
    return y


# ----------------------------------- main -------------------------------------

if __name__ == "__main__":
    N, T, D = 2, 8, 32                      # batch, seq, dim_model
    num_layers, num_heads = 2, 2
    dim_feedforward, dim_q, dim_k = 64, 8, 8

    key = jax.random.PRNGKey(0)
    kx, kp = jax.random.split(key)
    x = jax.random.normal(kx, (N, T, D), jnp.float32)
    params = init_params(kp, num_layers, num_heads, D, dim_feedforward, dim_q, dim_k)

    y_ref = _ref_encoder(x, params, num_heads, dim_q, dim_k)

    # 1) Strict-accuracy path: f32 matmuls, exact reciprocals — tight check vs f32 ref.
    y32 = transformer_encoder(x, params, num_heads=num_heads, dim_q=dim_q, dim_k=dim_k,
                              matmul_dtype=jnp.float32)
    y32 = jax.block_until_ready(y32)
    assert y32.shape == (N, T, D)
    err32 = float(jnp.max(jnp.abs(y32 - y_ref)))
    assert err32 < 2e-3, f"f32 path mismatch vs reference, max abs diff {err32}"

    # 2) Production path: bf16 weights/matmuls (MXU-native on v5e/v6e/v7x) + approx EUP
    #    softmax reciprocal.  Loose sanity check only — bf16 is a reduced-precision mode.
    ybf = transformer_encoder(x, params, num_heads=num_heads, dim_q=dim_q, dim_k=dim_k,
                              matmul_dtype=jnp.bfloat16)
    ybf = jax.block_until_ready(ybf)
    errbf = float(jnp.max(jnp.abs(ybf - y_ref)))
    assert errbf < 0.5, f"bf16 path diverged from reference, max abs diff {errbf}"

    print("KERNEL_OK")
</pallas_src>

<mosaic_0001>
module attributes {stable_mosaic.version = 11 : i64} {
  func.func @transformer_encoder_kernel(%arg0: i32, %arg1: i32, %arg2: memref<1x8x32xf32, #tpu.memory_space<vmem>>, %arg3: memref<1x8x32xf32, #tpu.memory_space<vmem>>, %arg4: memref<1x32x48xf32, #tpu.memory_space<vmem>>, %arg5: memref<1x1x48xf32, #tpu.memory_space<vmem>>, %arg6: memref<1x16x32xf32, #tpu.memory_space<vmem>>, %arg7: memref<1x1x32xf32, #tpu.memory_space<vmem>>, %arg8: memref<1x1x32xf32, #tpu.memory_space<vmem>>, %arg9: memref<1x1x32xf32, #tpu.memory_space<vmem>>, %arg10: memref<1x32x64xf32, #tpu.memory_space<vmem>>, %arg11: memref<1x1x64xf32, #tpu.memory_space<vmem>>, %arg12: memref<1x64x32xf32, #tpu.memory_space<vmem>>, %arg13: memref<1x1x32xf32, #tpu.memory_space<vmem>>, %arg14: memref<1x1x32xf32, #tpu.memory_space<vmem>>, %arg15: memref<1x1x32xf32, #tpu.memory_space<vmem>>, %arg16: memref<1x8x32xf32, #tpu.memory_space<vmem>>) attributes {dimension_semantics = [#tpu.dimension_semantics<parallel>, #tpu.dimension_semantics<arbitrary>], iteration_bounds = array<i64: 2, 2>, scalar_prefetch = 0 : i64, scratch_operands = 0 : i64, tpu.core_type = #tpu.core_type<tc>, window_params = [{transform_indices = @transform_0, window_bounds = array<i64: 1, 8, 32>}, {pipeline_mode = #tpu.pipeline_mode<synchronous>, transform_indices = @transform_1, window_bounds = array<i64: 1, 8, 32>}, {transform_indices = @transform_2, window_bounds = array<i64: 1, 32, 48>}, {transform_indices = @transform_3, window_bounds = array<i64: 1, 1, 48>}, {transform_indices = @transform_4, window_bounds = array<i64: 1, 16, 32>}, {transform_indices = @transform_5, window_bounds = array<i64: 1, 1, 32>}, {transform_indices = @transform_6, window_bounds = array<i64: 1, 1, 32>}, {transform_indices = @transform_7, window_bounds = array<i64: 1, 1, 32>}, {transform_indices = @transform_8, window_bounds = array<i64: 1, 32, 64>}, {transform_indices = @transform_9, window_bounds = array<i64: 1, 1, 64>}, {transform_indices = @transform_10, window_bounds = array<i64: 1, 64, 32>}, {transform_indices = @transform_11, window_bounds = array<i64: 1, 1, 32>}, {transform_indices = @transform_12, window_bounds = array<i64: 1, 1, 32>}, {transform_indices = @transform_13, window_bounds = array<i64: 1, 1, 32>}, {transform_indices = @transform_14, window_bounds = array<i64: 1, 8, 32>}]} {
    %c0_i32 = arith.constant 0 : i32
    %0 = arith.cmpi eq, %arg1, %c0_i32 : i32
    %1 = arith.extui %0 : i1 to i32
    %c0_i32_0 = arith.constant 0 : i32
    %2 = arith.cmpi ne, %1, %c0_i32_0 : i32
    scf.if %2 {
      %c0_83 = arith.constant 0 : index
      %c0_84 = arith.constant 0 : index
      %c0_85 = arith.constant 0 : index
      %177 = vector.load %arg2[%c0_83, %c0_84, %c0_85] : memref<1x8x32xf32, #tpu.memory_space<vmem>>, vector<1x8x32xf32>
      %c0_86 = arith.constant 0 : index
      %c0_87 = arith.constant 0 : index
      %c0_88 = arith.constant 0 : index
      %178 = vector.load %arg3[%c0_86, %c0_87, %c0_88] : memref<1x8x32xf32, #tpu.memory_space<vmem>>, vector<1x8x32xf32>
      %179 = arith.addf %177, %178 : vector<1x8x32xf32>
      %c0_89 = arith.constant 0 : index
      %c0_90 = arith.constant 0 : index
      %c0_91 = arith.constant 0 : index
      %180 = vector.load %arg16[%c0_89, %c0_90, %c0_91] : memref<1x8x32xf32, #tpu.memory_space<vmem>>, vector<1x8x32xf32>
      tpu.vector_store %arg16[%c0_89, %c0_90, %c0_91], %179 {strides = array<i32>} : memref<1x8x32xf32, #tpu.memory_space<vmem>>, vector<1x8x32xf32>,
    } else {
    }
    %c0 = arith.constant 0 : index
    %c0_1 = arith.constant 0 : index
    %c0_2 = arith.constant 0 : index
    %3 = vector.load %arg16[%c0, %c0_1, %c0_2] : memref<1x8x32xf32, #tpu.memory_space<vmem>>, vector<1x8x32xf32>
    %4 = vector.shape_cast %3 : vector<1x8x32xf32> to vector<8x32xf32>
    %c0_3 = arith.constant 0 : index
    %c0_4 = arith.constant 0 : index
    %c0_5 = arith.constant 0 : index
    %5 = vector.load %arg4[%c0_3, %c0_4, %c0_5] : memref<1x32x48xf32, #tpu.memory_space<vmem>>, vector<1x32x48xf32>
    %6 = vector.shape_cast %5 : vector<1x32x48xf32> to vector<32x48xf32>
    %cst = arith.constant dense<0.000000e+00> : vector<8x48xf32>
    %7 = tpu.matmul %4, %6, %cst {dimension_numbers = #tpu.dot_dimension_numbers<[1], [0], [0], [1], [0, 0, 1, 1], [], []>, precision = #tpu.contract_precision<fp32>} : vector<8x32xf32>, vector<32x48xf32>, vector<8x48xf32> -> vector<8x48xf32>
    %c0_6 = arith.constant 0 : index
    %c0_7 = arith.constant 0 : index
    %c0_8 = arith.constant 0 : index
    %8 = vector.load %arg5[%c0_6, %c0_7, %c0_8] : memref<1x1x48xf32, #tpu.memory_space<vmem>>, vector<1x1x48xf32>
    %9 = vector.shape_cast %8 : vector<1x1x48xf32> to vector<1x48xf32>
    %10 = vector.broadcast %9 : vector<1x48xf32> to vector<8x48xf32>
    %11 = arith.addf %7, %10 : vector<8x48xf32>
    %12 = vector.extract_strided_slice %11 {offsets = [0, 0], sizes = [8, 16], strides = [1, 1]} : vector<8x48xf32> to vector<8x16xf32>
    %13 = vector.shape_cast %12 : vector<8x16xf32> to vector<1x8x16xf32>
    %14 = vector.extract_strided_slice %11 {offsets = [0, 16], sizes = [8, 16], strides = [1, 1]} : vector<8x48xf32> to vector<8x16xf32>
    %15 = vector.shape_cast %14 : vector<8x16xf32> to vector<1x8x16xf32>
    %16 = vector.extract_strided_slice %11 {offsets = [0, 32], sizes = [8, 16], strides = [1, 1]} : vector<8x48xf32> to vector<8x16xf32>
    %17 = vector.shape_cast %16 : vector<8x16xf32> to vector<1x8x16xf32>
    %18 = vector.extract_strided_slice %13 {offsets = [0, 0, 0], sizes = [1, 8, 8], strides = [1, 1, 1]} : vector<1x8x16xf32> to vector<1x8x8xf32>
    %19 = vector.extract_strided_slice %15 {offsets = [0, 0, 0], sizes = [1, 8, 8], strides = [1, 1, 1]} : vector<1x8x16xf32> to vector<1x8x8xf32>
    %20 = vector.extract_strided_slice %17 {offsets = [0, 0, 0], sizes = [1, 8, 8], strides = [1, 1, 1]} : vector<1x8x16xf32> to vector<1x8x8xf32>
    "tpu.trace_start"() <{level = 10 : i32, message = "bqd,bkd->bqk"}> : () -> ()
    %cst_9 = arith.constant dense<0.000000e+00> : vector<1x8x8xf32>
    %21 = tpu.matmul %18, %19, %cst_9 {dimension_numbers = #tpu.dot_dimension_numbers<[2], [2], [1], [1], [0, 0, 0, 1, 1, 1], [0], [0]>, precision = #tpu.contract_precision<fp32>} : vector<1x8x8xf32>, vector<1x8x8xf32>, vector<1x8x8xf32> -> vector<1x8x8xf32>
    "tpu.trace_stop"() : () -> ()
    %cst_10 = arith.constant 0.353553385 : f32
    %22 = vector.broadcast %cst_10 : f32 to vector<1x8x8xf32>
    %23 = arith.mulf %21, %22 : vector<1x8x8xf32>
    %cst_11 = arith.constant dense<0xFF800000> : vector<1x8xf32>
    %24 = vector.multi_reduction <maximumf>, %23, %cst_11 [2] : vector<1x8x8xf32> to vector<1x8xf32>
    %25 = vector.shape_cast %24 : vector<1x8xf32> to vector<1x8x1xf32>
    %26 = vector.broadcast %25 : vector<1x8x1xf32> to vector<1x8x8xf32>
    %27 = arith.subf %23, %26 : vector<1x8x8xf32>
    %28 = math.exp %27 : vector<1x8x8xf32>
    %cst_12 = arith.constant dense<0.000000e+00> : vector<1x8xf32>
    %29 = vector.multi_reduction <add>, %28, %cst_12 [2] : vector<1x8x8xf32> to vector<1x8xf32>
    %30 = vector.shape_cast %29 : vector<1x8xf32> to vector<1x8x1xf32>
    %31 = tpu.reciprocal %30 : vector<1x8x1xf32> -> vector<1x8x1xf32>
    %32 = vector.broadcast %31 : vector<1x8x1xf32> to vector<1x8x8xf32>
    %33 = arith.mulf %28, %32 : vector<1x8x8xf32>
    "tpu.trace_start"() <{level = 10 : i32, message = "bqk,bkd->bqd"}> : () -> ()
    %cst_13 = arith.constant dense<0.000000e+00> : vector<1x8x8xf32>
    %34 = tpu.matmul %33, %20, %cst_13 {dimension_numbers = #tpu.dot_dimension_numbers<[2], [1], [1], [2], [0, 0, 0, 1, 1, 2], [0], [0]>, precision = #tpu.contract_precision<fp32>} : vector<1x8x8xf32>, vector<1x8x8xf32>, vector<1x8x8xf32> -> vector<1x8x8xf32>
    "tpu.trace_stop"() : () -> ()
    %35 = vector.shape_cast %34 : vector<1x8x8xf32> to vector<8x8xf32>
    %36 = vector.extract_strided_slice %13 {offsets = [0, 0, 8], sizes = [1, 8, 8], strides = [1, 1, 1]} : vector<1x8x16xf32> to vector<1x8x8xf32>
    %37 = vector.extract_strided_slice %15 {offsets = [0, 0, 8], sizes = [1, 8, 8], strides = [1, 1, 1]} : vector<1x8x16xf32> to vector<1x8x8xf32>
    %38 = vector.extract_strided_slice %17 {offsets = [0, 0, 8], sizes = [1, 8, 8], strides = [1, 1, 1]} : vector<1x8x16xf32> to vector<1x8x8xf32>
    "tpu.trace_start"() <{level = 10 : i32, message = "bqd,bkd->bqk"}> : () -> ()
    %cst_14 = arith.constant dense<0.000000e+00> : vector<1x8x8xf32>
    %39 = tpu.matmul %36, %37, %cst_14 {dimension_numbers = #tpu.dot_dimension_numbers<[2], [2], [1], [1], [0, 0, 0, 1, 1, 1], [0], [0]>, precision = #tpu.contract_precision<fp32>} : vector<1x8x8xf32>, vector<1x8x8xf32>, vector<1x8x8xf32> -> vector<1x8x8xf32>
    "tpu.trace_stop"() : () -> ()
    %cst_15 = arith.constant 0.353553385 : f32
    %40 = vector.broadcast %cst_15 : f32 to vector<1x8x8xf32>
    %41 = arith.mulf %39, %40 : vector<1x8x8xf32>
    %cst_16 = arith.constant dense<0xFF800000> : vector<1x8xf32>
    %42 = vector.multi_reduction <maximumf>, %41, %cst_16 [2] : vector<1x8x8xf32> to vector<1x8xf32>
    %43 = vector.shape_cast %42 : vector<1x8xf32> to vector<1x8x1xf32>
    %44 = vector.broadcast %43 : vector<1x8x1xf32> to vector<1x8x8xf32>
    %45 = arith.subf %41, %44 : vector<1x8x8xf32>
    %46 = math.exp %45 : vector<1x8x8xf32>
    %cst_17 = arith.constant dense<0.000000e+00> : vector<1x8xf32>
    %47 = vector.multi_reduction <add>, %46, %cst_17 [2] : vector<1x8x8xf32> to vector<1x8xf32>
    %48 = vector.shape_cast %47 : vector<1x8xf32> to vector<1x8x1xf32>
    %49 = tpu.reciprocal %48 : vector<1x8x1xf32> -> vector<1x8x1xf32>
    %50 = vector.broadcast %49 : vector<1x8x1xf32> to vector<1x8x8xf32>
    %51 = arith.mulf %46, %50 : vector<1x8x8xf32>
    "tpu.trace_start"() <{level = 10 : i32, message = "bqk,bkd->bqd"}> : () -> ()
    %cst_18 = arith.constant dense<0.000000e+00> : vector<1x8x8xf32>
    %52 = tpu.matmul %51, %38, %cst_18 {dimension_numbers = #tpu.dot_dimension_numbers<[2], [1], [1], [2], [0, 0, 0, 1, 1, 2], [0], [0]>, precision = #tpu.contract_precision<fp32>} : vector<1x8x8xf32>, vector<1x8x8xf32>, vector<1x8x8xf32> -> vector<1x8x8xf32>
    "tpu.trace_stop"() : () -> ()
    %53 = vector.shape_cast %52 : vector<1x8x8xf32> to vector<8x8xf32>
    %54 = tpu.concatenate %35, %53 in 1 : vector<8x8xf32>, vector<8x8xf32> -> vector<8x16xf32>
    %c0_19 = arith.constant 0 : index
    %c0_20 = arith.constant 0 : index
    %c0_21 = arith.constant 0 : index
    %55 = vector.load %arg6[%c0_19, %c0_20, %c0_21] : memref<1x16x32xf32, #tpu.memory_space<vmem>>, vector<1x16x32xf32>
    %56 = vector.shape_cast %55 : vector<1x16x32xf32> to vector<16x32xf32>
    %cst_22 = arith.constant dense<0.000000e+00> : vector<8x32xf32>
    %57 = tpu.matmul %54, %56, %cst_22 {dimension_numbers = #tpu.dot_dimension_numbers<[1], [0], [0], [1], [0, 0, 1, 1], [], []>, precision = #tpu.contract_precision<fp32>} : vector<8x16xf32>, vector<16x32xf32>, vector<8x32xf32> -> vector<8x32xf32>
    %c0_23 = arith.constant 0 : index
    %c0_24 = arith.constant 0 : index
    %c0_25 = arith.constant 0 : index
    %58 = vector.load %arg7[%c0_23, %c0_24, %c0_25] : memref<1x1x32xf32, #tpu.memory_space<vmem>>, vector<1x1x32xf32>
    %59 = vector.shape_cast %58 : vector<1x1x32xf32> to vector<1x32xf32>
    %60 = vector.broadcast %59 : vector<1x32xf32> to vector<8x32xf32>
    %61 = arith.addf %57, %60 : vector<8x32xf32>
    %c0_26 = arith.constant 0 : index
    %c0_27 = arith.constant 0 : index
    %c0_28 = arith.constant 0 : index
    %62 = vector.load %arg8[%c0_26, %c0_27, %c0_28] : memref<1x1x32xf32, #tpu.memory_space<vmem>>, vector<1x1x32xf32>
    %63 = vector.shape_cast %62 : vector<1x1x32xf32> to vector<1x32xf32>
    %c0_29 = arith.constant 0 : index
    %c0_30 = arith.constant 0 : index
    %c0_31 = arith.constant 0 : index
    %64 = vector.load %arg9[%c0_29, %c0_30, %c0_31] : memref<1x1x32xf32, #tpu.memory_space<vmem>>, vector<1x1x32xf32>
    %65 = vector.shape_cast %64 : vector<1x1x32xf32> to vector<1x32xf32>
    %cst_32 = arith.constant dense<0.000000e+00> : vector<8xf32>
    %66 = vector.multi_reduction <add>, %61, %cst_32 [1] : vector<8x32xf32> to vector<8xf32>
    %67 = vector.shape_cast %66 : vector<8xf32> to vector<8x1xf32>
    %cst_33 = arith.constant 3.200000e+01 : f32
    %68 = vector.broadcast %cst_33 : f32 to vector<8x1xf32>
    %69 = arith.divf %67, %68 : vector<8x1xf32>
    %70 = arith.mulf %61, %61 : vector<8x32xf32>
    %cst_34 = arith.constant dense<0.000000e+00> : vector<8xf32>
    %71 = vector.multi_reduction <add>, %70, %cst_34 [1] : vector<8x32xf32> to vector<8xf32>
    %72 = vector.shape_cast %71 : vector<8xf32> to vector<8x1xf32>
    %cst_35 = arith.constant 3.200000e+01 : f32
    %73 = vector.broadcast %cst_35 : f32 to vector<8x1xf32>
    %74 = arith.divf %72, %73 : vector<8x1xf32>
    %75 = arith.mulf %69, %69 : vector<8x1xf32>
    %76 = arith.subf %74, %75 : vector<8x1xf32>
    %cst_36 = arith.constant 0.000000e+00 : f32
    %77 = vector.broadcast %cst_36 : f32 to vector<8x1xf32>
    %78 = arith.maximumf %76, %77 : vector<8x1xf32>
    %79 = vector.broadcast %69 : vector<8x1xf32> to vector<8x32xf32>
    %80 = arith.subf %61, %79 : vector<8x32xf32>
    %cst_37 = arith.constant 9.99999974E-6 : f32
    %81 = vector.broadcast %cst_37 : f32 to vector<8x1xf32>
    %82 = arith.addf %78, %81 : vector<8x1xf32>
    %83 = math.rsqrt %82 : vector<8x1xf32>
    %84 = vector.broadcast %83 : vector<8x1xf32> to vector<8x32xf32>
    %85 = arith.mulf %80, %84 : vector<8x32xf32>
    %86 = vector.broadcast %63 : vector<1x32xf32> to vector<8x32xf32>
    %87 = arith.mulf %85, %86 : vector<8x32xf32>
    %88 = vector.broadcast %65 : vector<1x32xf32> to vector<8x32xf32>
    %89 = arith.addf %87, %88 : vector<8x32xf32>
    %90 = arith.addf %4, %89 : vector<8x32xf32>
    %c0_38 = arith.constant 0 : index
    %c0_39 = arith.constant 0 : index
    %c0_40 = arith.constant 0 : index
    %91 = vector.load %arg10[%c0_38, %c0_39, %c0_40] : memref<1x32x64xf32, #tpu.memory_space<vmem>>, vector<1x32x64xf32>
    %92 = vector.shape_cast %91 : vector<1x32x64xf32> to vector<32x64xf32>
    %cst_41 = arith.constant dense<0.000000e+00> : vector<8x64xf32>
    %93 = tpu.matmul %90, %92, %cst_41 {dimension_numbers = #tpu.dot_dimension_numbers<[1], [0], [0], [1], [0, 0, 1, 1], [], []>, precision = #tpu.contract_precision<fp32>} : vector<8x32xf32>, vector<32x64xf32>, vector<8x64xf32> -> vector<8x64xf32>
    %c0_42 = arith.constant 0 : index
    %c0_43 = arith.constant 0 : index
    %c0_44 = arith.constant 0 : index
    %94 = vector.load %arg11[%c0_42, %c0_43, %c0_44] : memref<1x1x64xf32, #tpu.memory_space<vmem>>, vector<1x1x64xf32>
    %95 = vector.shape_cast %94 : vector<1x1x64xf32> to vector<1x64xf32>
    %96 = vector.broadcast %95 : vector<1x64xf32> to vector<8x64xf32>
    %97 = arith.addf %93, %96 : vector<8x64xf32>
    %cst_45 = arith.constant 5.000000e-01 : f32
    %98 = vector.broadcast %cst_45 : f32 to vector<8x64xf32>
    %99 = arith.mulf %98, %97 : vector<8x64xf32>
    %cst_46 = arith.constant 0.707106769 : f32
    %100 = vector.broadcast %cst_46 : f32 to vector<8x64xf32>
    %101 = arith.mulf %97, %100 : vector<8x64xf32>
    %cst_47 = arith.constant 0.000000e+00 : f32
    %102 = vector.broadcast %cst_47 : f32 to vector<8x64xf32>
    %103 = arith.cmpf oge, %101, %102 : vector<8x64xf32>
    %cst_48 = arith.constant 1.000000e+00 : f32
    %cst_49 = arith.constant -1.000000e+00 : f32
    %104 = vector.broadcast %cst_48 : f32 to vector<8x64xf32>
    %105 = vector.broadcast %cst_49 : f32 to vector<8x64xf32>
    %106 = arith.select %103, %104, %105 : vector<8x64xi1>, vector<8x64xf32>
    %107 = math.absf %101 : vector<8x64xf32>
    %cst_50 = arith.constant 0.327591091 : f32
    %108 = vector.broadcast %cst_50 : f32 to vector<8x64xf32>
    %109 = arith.mulf %108, %107 : vector<8x64xf32>
    %cst_51 = arith.constant 1.000000e+00 : f32
    %110 = vector.broadcast %cst_51 : f32 to vector<8x64xf32>
    %111 = arith.addf %110, %109 : vector<8x64xf32>
    %cst_52 = arith.constant 1.000000e+00 : f32
    %112 = vector.broadcast %cst_52 : f32 to vector<8x64xf32>
    %113 = arith.divf %112, %111 : vector<8x64xf32>
    %cst_53 = arith.constant 1.06140542 : f32
    %114 = vector.broadcast %cst_53 : f32 to vector<8x64xf32>
    %115 = arith.mulf %114, %113 : vector<8x64xf32>
    %cst_54 = arith.constant -1.45315206 : f32
    %116 = vector.broadcast %cst_54 : f32 to vector<8x64xf32>
    %117 = arith.addf %115, %116 : vector<8x64xf32>
    %118 = arith.mulf %117, %113 : vector<8x64xf32>
    %cst_55 = arith.constant 1.42141378 : f32
    %119 = vector.broadcast %cst_55 : f32 to vector<8x64xf32>
    %120 = arith.addf %118, %119 : vector<8x64xf32>
    %121 = arith.mulf %120, %113 : vector<8x64xf32>
    %cst_56 = arith.constant -0.284496725 : f32
    %122 = vector.broadcast %cst_56 : f32 to vector<8x64xf32>
    %123 = arith.addf %121, %122 : vector<8x64xf32>
    %124 = arith.mulf %123, %113 : vector<8x64xf32>
    %cst_57 = arith.constant 0.254829586 : f32
    %125 = vector.broadcast %cst_57 : f32 to vector<8x64xf32>
    %126 = arith.addf %124, %125 : vector<8x64xf32>
    %127 = arith.mulf %126, %113 : vector<8x64xf32>
    %cst_58 = arith.constant 0.000000e+00 : f32
    %128 = vector.broadcast %cst_58 : f32 to vector<8x64xf32>
    %129 = arith.subf %128, %107 : vector<8x64xf32>
    %130 = arith.mulf %129, %107 : vector<8x64xf32>
    %131 = math.exp %130 : vector<8x64xf32>
    %132 = arith.mulf %127, %131 : vector<8x64xf32>
    %cst_59 = arith.constant 1.000000e+00 : f32
    %133 = vector.broadcast %cst_59 : f32 to vector<8x64xf32>
    %134 = arith.subf %133, %132 : vector<8x64xf32>
    %135 = arith.mulf %106, %134 : vector<8x64xf32>
    %cst_60 = arith.constant 1.000000e+00 : f32
    %136 = vector.broadcast %cst_60 : f32 to vector<8x64xf32>
    %137 = arith.addf %136, %135 : vector<8x64xf32>
    %138 = arith.mulf %99, %137 : vector<8x64xf32>
    %c0_61 = arith.constant 0 : index
    %c0_62 = arith.constant 0 : index
    %c0_63 = arith.constant 0 : index
    %139 = vector.load %arg12[%c0_61, %c0_62, %c0_63] : memref<1x64x32xf32, #tpu.memory_space<vmem>>, vector<1x64x32xf32>
    %140 = vector.shape_cast %139 : vector<1x64x32xf32> to vector<64x32xf32>
    %cst_64 = arith.constant dense<0.000000e+00> : vector<8x32xf32>
    %141 = tpu.matmul %138, %140, %cst_64 {dimension_numbers = #tpu.dot_dimension_numbers<[1], [0], [0], [1], [0, 0, 1, 1], [], []>, precision = #tpu.contract_precision<fp32>} : vector<8x64xf32>, vector<64x32xf32>, vector<8x32xf32> -> vector<8x32xf32>
    %c0_65 = arith.constant 0 : index
    %c0_66 = arith.constant 0 : index
    %c0_67 = arith.constant 0 : index
    %142 = vector.load %arg13[%c0_65, %c0_66, %c0_67] : memref<1x1x32xf32, #tpu.memory_space<vmem>>, vector<1x1x32xf32>
    %143 = vector.shape_cast %142 : vector<1x1x32xf32> to vector<1x32xf32>
    %144 = vector.broadcast %143 : vector<1x32xf32> to vector<8x32xf32>
    %145 = arith.addf %141, %144 : vector<8x32xf32>
    %c0_68 = arith.constant 0 : index
    %c0_69 = arith.constant 0 : index
    %c0_70 = arith.constant 0 : index
    %146 = vector.load %arg14[%c0_68, %c0_69, %c0_70] : memref<1x1x32xf32, #tpu.memory_space<vmem>>, vector<1x1x32xf32>
    %147 = vector.shape_cast %146 : vector<1x1x32xf32> to vector<1x32xf32>
    %c0_71 = arith.constant 0 : index
    %c0_72 = arith.constant 0 : index
    %c0_73 = arith.constant 0 : index
    %148 = vector.load %arg15[%c0_71, %c0_72, %c0_73] : memref<1x1x32xf32, #tpu.memory_space<vmem>>, vector<1x1x32xf32>
    %149 = vector.shape_cast %148 : vector<1x1x32xf32> to vector<1x32xf32>
    %cst_74 = arith.constant dense<0.000000e+00> : vector<8xf32>
    %150 = vector.multi_reduction <add>, %145, %cst_74 [1] : vector<8x32xf32> to vector<8xf32>
    %151 = vector.shape_cast %150 : vector<8xf32> to vector<8x1xf32>
    %cst_75 = arith.constant 3.200000e+01 : f32
    %152 = vector.broadcast %cst_75 : f32 to vector<8x1xf32>
    %153 = arith.divf %151, %152 : vector<8x1xf32>
    %154 = arith.mulf %145, %145 : vector<8x32xf32>
    %cst_76 = arith.constant dense<0.000000e+00> : vector<8xf32>
    %155 = vector.multi_reduction <add>, %154, %cst_76 [1] : vector<8x32xf32> to vector<8xf32>
    %156 = vector.shape_cast %155 : vector<8xf32> to vector<8x1xf32>
    %cst_77 = arith.constant 3.200000e+01 : f32
    %157 = vector.broadcast %cst_77 : f32 to vector<8x1xf32>
    %158 = arith.divf %156, %157 : vector<8x1xf32>
    %159 = arith.mulf %153, %153 : vector<8x1xf32>
    %160 = arith.subf %158, %159 : vector<8x1xf32>
    %cst_78 = arith.constant 0.000000e+00 : f32
    %161 = vector.broadcast %cst_78 : f32 to vector<8x1xf32>
    %162 = arith.maximumf %160, %161 : vector<8x1xf32>
    %163 = vector.broadcast %153 : vector<8x1xf32> to vector<8x32xf32>
    %164 = arith.subf %145, %163 : vector<8x32xf32>
    %cst_79 = arith.constant 9.99999974E-6 : f32
    %165 = vector.broadcast %cst_79 : f32 to vector<8x1xf32>
    %166 = arith.addf %162, %165 : vector<8x1xf32>
    %167 = math.rsqrt %166 : vector<8x1xf32>
    %168 = vector.broadcast %167 : vector<8x1xf32> to vector<8x32xf32>
    %169 = arith.mulf %164, %168 : vector<8x32xf32>
    %170 = vector.broadcast %147 : vector<1x32xf32> to vector<8x32xf32>
    %171 = arith.mulf %169, %170 : vector<8x32xf32>
    %172 = vector.broadcast %149 : vector<1x32xf32> to vector<8x32xf32>
    %173 = arith.addf %171, %172 : vector<8x32xf32>
    %174 = arith.addf %90, %173 : vector<8x32xf32>
    %175 = vector.shape_cast %174 : vector<8x32xf32> to vector<1x8x32xf32>
    %c0_80 = arith.constant 0 : index
    %c0_81 = arith.constant 0 : index
    %c0_82 = arith.constant 0 : index
    %176 = vector.load %arg16[%c0_80, %c0_81, %c0_82] : memref<1x8x32xf32, #tpu.memory_space<vmem>>, vector<1x8x32xf32>
    tpu.vector_store %arg16[%c0_80, %c0_81, %c0_82], %175 {strides = array<i32>} : memref<1x8x32xf32, #tpu.memory_space<vmem>>, vector<1x8x32xf32>,
    return
  }
  func.func @transform_0(%arg0: i32, %arg1: i32) -> (i32, i32, i32) {
    %c0_i32 = arith.constant 0 : i32
    %c0_i32_0 = arith.constant 0 : i32
    %c0_i32_1 = arith.constant 0 : i32
    return %arg0, %c0_i32, %c0_i32_0 : i32, i32, i32
  }
  func.func @transform_1(%arg0: i32, %arg1: i32) -> (i32, i32, i32) {
    %c0_i32 = arith.constant 0 : i32
    %c0_i32_0 = arith.constant 0 : i32
    %c0_i32_1 = arith.constant 0 : i32
    %c0_i32_2 = arith.constant 0 : i32
    return %c0_i32, %c0_i32_0, %c0_i32_1 : i32, i32, i32
  }
  func.func @transform_2(%arg0: i32, %arg1: i32) -> (i32, i32, i32) {
    %c0_i32 = arith.constant 0 : i32
    %c0_i32_0 = arith.constant 0 : i32
    %c0_i32_1 = arith.constant 0 : i32
    return %arg1, %c0_i32, %c0_i32_0 : i32, i32, i32
  }
  func.func @transform_3(%arg0: i32, %arg1: i32) -> (i32, i32, i32) {
    %c0_i32 = arith.constant 0 : i32
    %c0_i32_0 = arith.constant 0 : i32
    %c0_i32_1 = arith.constant 0 : i32
    return %arg1, %c0_i32, %c0_i32_0 : i32, i32, i32
  }
  func.func @transform_4(%arg0: i32, %arg1: i32) -> (i32, i32, i32) {
    %c0_i32 = arith.constant 0 : i32
    %c0_i32_0 = arith.constant 0 : i32
    %c0_i32_1 = arith.constant 0 : i32
    return %arg1, %c0_i32, %c0_i32_0 : i32, i32, i32
  }
  func.func @transform_5(%arg0: i32, %arg1: i32) -> (i32, i32, i32) {
    %c0_i32 = arith.constant 0 : i32
    %c0_i32_0 = arith.constant 0 : i32
    %c0_i32_1 = arith.constant 0 : i32
    return %arg1, %c0_i32, %c0_i32_0 : i32, i32, i32
  }
  func.func @transform_6(%arg0: i32, %arg1: i32) -> (i32, i32, i32) {
    %c0_i32 = arith.constant 0 : i32
    %c0_i32_0 = arith.constant 0 : i32
    %c0_i32_1 = arith.constant 0 : i32
    return %arg1, %c0_i32, %c0_i32_0 : i32, i32, i32
  }
  func.func @transform_7(%arg0: i32, %arg1: i32) -> (i32, i32, i32) {
    %c0_i32 = arith.constant 0 : i32
    %c0_i32_0 = arith.constant 0 : i32
    %c0_i32_1 = arith.constant 0 : i32
    return %arg1, %c0_i32, %c0_i32_0 : i32, i32, i32
  }
  func.func @transform_8(%arg0: i32, %arg1: i32) -> (i32, i32, i32) {
    %c0_i32 = arith.constant 0 : i32
    %c0_i32_0 = arith.constant 0 : i32
    %c0_i32_1 = arith.constant 0 : i32
    return %arg1, %c0_i32, %c0_i32_0 : i32, i32, i32
  }
  func.func @transform_9(%arg0: i32, %arg1: i32) -> (i32, i32, i32) {
    %c0_i32 = arith.constant 0 : i32
    %c0_i32_0 = arith.constant 0 : i32
    %c0_i32_1 = arith.constant 0 : i32
    return %arg1, %c0_i32, %c0_i32_0 : i32, i32, i32
  }
  func.func @transform_10(%arg0: i32, %arg1: i32) -> (i32, i32, i32) {
    %c0_i32 = arith.constant 0 : i32
    %c0_i32_0 = arith.constant 0 : i32
    %c0_i32_1 = arith.constant 0 : i32
    return %arg1, %c0_i32, %c0_i32_0 : i32, i32, i32
  }
  func.func @transform_11(%arg0: i32, %arg1: i32) -> (i32, i32, i32) {
    %c0_i32 = arith.constant 0 : i32
    %c0_i32_0 = arith.constant 0 : i32
    %c0_i32_1 = arith.constant 0 : i32
    return %arg1, %c0_i32, %c0_i32_0 : i32, i32, i32
  }
  func.func @transform_12(%arg0: i32, %arg1: i32) -> (i32, i32, i32) {
    %c0_i32 = arith.constant 0 : i32
    %c0_i32_0 = arith.constant 0 : i32
    %c0_i32_1 = arith.constant 0 : i32
    return %arg1, %c0_i32, %c0_i32_0 : i32, i32, i32
  }
  func.func @transform_13(%arg0: i32, %arg1: i32) -> (i32, i32, i32) {
    %c0_i32 = arith.constant 0 : i32
    %c0_i32_0 = arith.constant 0 : i32
    %c0_i32_1 = arith.constant 0 : i32
    return %arg1, %c0_i32, %c0_i32_0 : i32, i32, i32
  }
  func.func @transform_14(%arg0: i32, %arg1: i32) -> (i32, i32, i32) {
    %c0_i32 = arith.constant 0 : i32
    %c0_i32_0 = arith.constant 0 : i32
    %c0_i32_1 = arith.constant 0 : i32
    return %arg0, %c0_i32, %c0_i32_0 : i32, i32, i32
  }
}

</mosaic_0001>

<bundles_post_ra>
// kernel: tpu_custom_call.1
= control target key start
LH: loop header
LB: loop body
LE: loop exit
PB: predicated region body
PF: predicated region fallthrough
CT: control target
= control target key end

     0   :  { %s6541_s0 = inlined_call_operand.vmem [shape: f32[2,8,32], index: 0, kind: input, shape index: {}]   ;;  %s6542_s1 = inlined_call_operand.vmem [shape: f32[1,8,32], index: 1, kind: input, shape index: {}]   ;;  %s6543_s2 = inlined_call_operand.vmem [shape: f32[2,32,48], index: 2, kind: input, shape index: {}]   ;;  %s6544_s3 = inlined_call_operand.vmem [shape: f32[2,1,48], index: 3, kind: input, shape index: {}]   ;;  %s6545_s4 = inlined_call_operand.vmem [shape: f32[2,16,32], index: 4, kind: input, shape index: {}]   ;;  %s6546_s5 = inlined_call_operand.vmem [shape: f32[2,1,32], index: 5, kind: input, shape index: {}]   ;;  %s6547_s6 = inlined_call_operand.vmem [shape: f32[2,1,32], index: 6, kind: input, shape index: {}]   ;;  %s6548_s7 = inlined_call_operand.vmem [shape: f32[2,1,32], index: 7, kind: input, shape index: {}]   ;;  %s6549_s8 = inlined_call_operand.vmem [shape: f32[2,32,64], index: 8, kind: input, shape index: {}]   ;;  %s6550_s9 = inlined_call_operand.vmem [shape: f32[2,1,64], index: 9, kind: input, shape index: {}]   ;;  %s6551_s10 = inlined_call_operand.vmem [shape: f32[2,64,32], index: 10, kind: input, shape index: {}]   ;;  %s6552_s11 = inlined_call_operand.vmem [shape: f32[2,1,32], index: 11, kind: input, shape index: {}]   ;;  %s6553_s12 = inlined_call_operand.vmem [shape: f32[2,1,32], index: 12, kind: input, shape index: {}]   ;;  %s6554_s13 = inlined_call_operand.vmem [shape: f32[2,1,32], index: 13, kind: input, shape index: {}]   ;;  %s6555_s14 = inlined_call_operand.hbm [shape: f32[2,8,32], index: 14, kind: output, shape index: {}]  }
   0x1   :  { %6571 = sst [smem:[#allocation18_spill]] %s6541_s0 }
   0x2   :  { %6572 = sst [smem:[#allocation19_spill]] %s6542_s1 }
   0x3   :  { %6573 = sst [smem:[#allocation20_spill]] %s6543_s2 }
   0x4   :  { %6574 = sst [smem:[#allocation21_spill]] %s6545_s4 }
   0x5   :  { %6575 = sst [smem:[#allocation22_spill]] %s6549_s8 }
   0x6   :  { %6576 = sst [smem:[#allocation23_spill]] %s6554_s13 }
   0x7   :  { %6577 = sst [smem:[#allocation24_spill]] %s6555_s14 }
   0x8   :  { %19 = vsyncpa [#allocation3], 0 }
   0x9   :  { %21 = vsyncpa [#allocation3 + $0x1], 0  ;;  %s5987_s29 = smov 0   ;;  %s5989_s30 = smov 0  }
   0xa   :  { %s5991_s15 = smov 0   ;;  %s5993_s16 = smov 0  }
   0xb   :  { %s5995_s17 = smov 0   ;;  %s5997_s18 = smov 0  }
   0xc   :  { %s5999_s19 = smov 0   ;;  %s6001_s20 = smov 0  }
   0xd LB: > { %6578 = sst [smem:[#allocation5_spill]] %s5871_s29  ;;  %s4844_s21 = sadd.s32 4294967295, %s5899_s20   ;;  %s5899_s20 = sphi %s6001_s20, %s27_s20   ;;  %s5895_s19 = sphi %s5999_s19, %s6620_s19   ;;  %s5891_s18 = sphi %s5997_s18, %s6619_s18   ;;  %s5887_s17 = sphi %s5995_s17, %s6618_s17   ;;  %s5883_s16 = sphi %s5993_s16, %s6617_s16   ;;  %s5879_s15 = sphi %s5991_s15, %s6616_s15   ;;  %s5875_s30 = sphi %s5989_s30, %s6615_s30   ;;  %s5871_s29 = sphi %s5987_s29, %s6614_s29  }
   0xe   : > { %6579 = sst [smem:[#allocation6_spill]] %s5875_s30  ;;  %s4845_s22 = sadd.s32 4294967294, %s5899_s20  }
   0xf   : > { %6580 = sst [smem:[#allocation7_spill]] %s5879_s15  ;;  %s36_s23 = sadd.s32 1, %s5891_s18 }
  0x10   : > { %6581 = sst [smem:[#allocation8_spill]] %s5883_s16  ;;  %p37_p0 = scmp.ge.s32.totalorder %s36_s23, 2 }
  0x11   : > { %6582 = sst [smem:[#allocation9_spill]] %s5887_s17  ;;  %s39_s24 = sadd.s32 1, %s5895_s19 }
  0x12   : > { %6583 = sst [smem:[#allocation10_spill]] %s5891_s18  ;;  %p415_p1 = scmp.ne.s32.totalorder %s5879_s15, %s5875_s30 }
  0x13   : > { %6584 = sst [smem:[#allocation11_spill]] %s5895_s19  ;;  %p416_p2 = scmp.eq.s32.totalorder %s4844_s21, 3 }
  0x14   : > { %6585 = sst [smem:[#allocation12_spill]] %s5899_s20  ;;  %s6622_s23 = smov (%p37_p0, %s36_s23), 0 }
  0x15   : > { %6586 = sst [smem:[#allocation13_spill]] %s6622_s23  ;;  %s6624_s24 = smov (!%p37_p0, %s39_s24), %s5895_s19 }
  0x16   : > { %p6036_p3 = por %p416_p2, %p415_p1  ;;  %p421_p4 = scmp.ne.s32.totalorder %s5875_s30, %s5871_s29 }
  0x17   : > { %p41_p5 = scmp.ge.s32.totalorder %s6624_s24, 2  ;;  %p422_p6 = scmp.eq.s32.totalorder %s4845_s22, 3 }
  0x18   : > { %s6587_s25 = scalar_select %p6036_p3, 1, 0 }
  0x19   : > { %p4848_p7 = scmp.ge.s32.totalorder %s5899_s20, 1  ;;  %p530_p8 = scmp.lt.s32.totalorder %s5899_s20, 5 }
  0x1a   : > { %6588 = sst [smem:[#allocation14_spill]] %s6587_s25  ;;  %s6626_s24 = smov (%p41_p5, %s6624_s24), 0 }
  0x1b   : > { %6589 = sst [smem:[#allocation15_spill]] %s6626_s24  ;;  %p6046_p9 = por %p422_p6, %p421_p4 }
  0x1c   : > { %p531_p10 = pnand %p4848_p7, %p530_p8  ;;  %s402_s27 = ssub.s32 %s5895_s19, %s6626_s24 }
  0x1d   : > { %s6590_s26 = scalar_select %p6046_p9, 1, 0 }
  0x1e   : > { %s405_s28 = sadd.s32 1, %s5879_s15  ;;  %p403_p11 = scmp.eq.s32.totalorder %s402_s27, 0 }
  0x1f   : > { %6591 = sst [smem:[#allocation16_spill]] %s6590_s26  ;;  %534 = sbr.rel (%p531_p10) target bundleno = 3187 (0xc73), region = 76 }
  0x20   : > { %s6054_s21 = scalar_select %p403_p11, %s5879_s15, %s405_s28  }
  0x21   : > { %s6559_s22 = sand.u32 (!%p531_p10), 1, %s5875_s30   ;;  %p619_p12 = scmp.lt.s32.totalorder (!%p531_p10), %s5887_s17, 1 }
  0x22   : > { %6592 = sst [smem:[#allocation17_spill]] %s6054_s21  ;;  %s4849_s23 = sshll.u32 (!%p531_p10), %s6559_s22, 3 }
  0x23   : > { %p623_p13 = scmp.lt.s32.totalorder (!%p531_p10), %s5883_s16, 1  ;;  %s6593_s0 = sld [smem:[#allocation18_spill]] (!%p531_p10) }
  0x24   : > { %s6594_s2 = sld [smem:[#allocation20_spill]] (!%p531_p10)  ;;  %s6595_s4 = sld [smem:[#allocation21_spill]] (!%p531_p10) }
  0x25   : > { %s6596_s8 = sld [smem:[#allocation22_spill]] (!%p531_p10)  ;;  %s6121_s1 = scalar_lea.vmem (!%p531_p10), [#allocation2], %s4849_s23 }
  0x26   : > { %s620_s18 = scalar_select %p619_p12, %s5887_s17, 1 }
  0x27   : > { %s6063_s26 = scalar_select %p623_p13, %s5883_s16, 1 }
  0x28   : > { %s4850_s27 = sshll.u32 %s620_s18, 3  ;;  %s6598_s17 = sld [smem:[#allocation8_spill]] }
  0x29   : > { %s622_s22 = scalar_lea.vmem %s6593_s0, %s4850_s27  ;;  %s4872_s19 = sshll.u32 %s6063_s26, 5 }
  0x2a   : > { %s627_s29 = scalar_lea.vmem %s6594_s2, %s4872_s19  ;;  %s4873_s30 = sshll.u32 %s6063_s26, 4 }
  0x2b   : > { %s6084_s24 = scalar_lea.vmem %s6595_s4, %s4873_s30  ;;  %s6097_s25 = scalar_lea.vmem %s6596_s8, %s4872_s19 }
  0x2c   : > { %s652_s16 = scalar_lea.vmem %s6550_s9, %s6063_s26  ;;  %s4875_s13 = sshll.u32 %s6063_s26, 6 }
  0x2d   : > { %s6107_s4 = scalar_lea.vmem %s6551_s10, %s4875_s13  ;;  %s660_s15 = scalar_lea.vmem %s6552_s11, %s6063_s26 }
  0x2e   : > { %s663_s14 = scalar_lea.vmem %s6553_s12, %s6063_s26  ;;  %s6597_s0 = sld [smem:[#allocation23_spill]] }
  0x2f   : > { %p4859_p0 = scmp.ne.s32.totalorder %s6598_s17, 0 }
  0x30   : > { %v671_v0 = vld [vmem:[%s622_s22] sm:$0xff] (!%p4859_p0)  ;;  %s6599_s18 = sld [smem:[#allocation19_spill]] (!%p4859_p0)  ;;  %vm674_vm0 = vcmask (!%p4859_p0), 261120  }
  0x31   : > { %670 = sbr.rel (%p4859_p0) target bundleno = 58 (0x3a), region = 80 }
  0x34   : > { %s666_s8 = scalar_lea.vmem %s6597_s0, %s6063_s26 }
  0x36   : > { %v672_v1 = vld [vmem:[%s6599_s18] sm:$0xff] (!%p4859_p0) }
  0x37   : > { %v673_v2 = vadd.f32 (!%p4859_p0), %v672_v1, %v671_v0 }
  0x39   : > { %675 = vst.msk [vmem:[%s6121_s1] sm:$0xff] %vm674_vm0, %v673_v2 }
  0x3a PF: > { %v677_v3 = vld [vmem:[%s627_s29] sm:$0xff]  ;;  %v678_v4 = vld [vmem:[%s627_s29 + $0x8] sm:$0xff]  ;;  %v679_v5 = vld [vmem:[%s627_s29 + $0x10] sm:$0xff]  ;;  %v5901_v6 = vmov 0.0|0.0   ;;  %vm5902_vm1 = vmmov 0   ;;  %v5903_v11 = vmov 0.0   ;;  %s6601_s17 = scalar_lea.vmem %s6546_s5, %s6063_s26  ;;  %s6602_s30 = scalar_lea.vmem %s6547_s6, %s6063_s26 }
  0x3b   : > { %5464 = vmatprep.subr.bf16.mxu0 %v5901_v6  ;;  %v693_v7 = vand.u32 4294901760, %v677_v3  ;;  %v696_v8 = vand.u32 4294901760, %v678_v4  ;;  %v680_v9 = vld [vmem:[%s627_s29 + $0x18] sm:$0xff]  ;;  %v699_v10 = vand.u32 4294901760, %v679_v5  ;;  %5064 = vmatprep.mubr.msk.f32.mxu0 %vm5902_vm1, %v5903_v11  ;;  %vm688_vm2 = vcmask 261120   ;;  %s6600_s29 = scalar_lea.vmem %s6544_s3, %s6063_s26  ;;  %s5904_s23 = smov 96  }
  0x3c   : > { %v702_v13 = vand.u32 4294901760, %v680_v9  ;;  %5122 = vmatprep.subr.mxu1 %v5903_v11  ;;  %5124 = vmatprep.mubr.msk.f32.mxu1 %vm5902_vm1, %v5903_v11  ;;  %v4860_v44 = vld [vmem:[%s6600_s29] ss:$0 sm:$0xff]  ;;  %s5905_s22 = smov 112   ;;  %vm1180_vm3 = vcmask 64512   ;;  %s5906_s27 = smov 104  }
  0x3d   : > { %v5465_v15 = vpack.c.bf16 %v696_v8, %v693_v7  ;;  %v773_v16 = vsub.f32 %v677_v3, %v693_v7  ;;  %v780_v17 = vsub.f32 %v678_v4, %v696_v8  ;;  %v787_v18 = vsub.f32 %v679_v5, %v699_v10  ;;  %s5907_s28 = smov 120   ;;  %s5908_s21 = smov 88  }
  0x3e   : > { %v794_v19 = vsub.f32 %v680_v9, %v702_v13  ;;  %v5468_v21 = vpack.c.bf16 %v702_v13, %v699_v10  ;;  %s5909_s19 = smov 8   ;;  %vm3027_vm4 = vcmask 130048   ;;  %s6603_s2 = scalar_lea.vmem %s6548_s7, %s6063_s26  ;;  %vm4065_vm6 = vcmask 523264  }
  0x3f   : > { %5466 = vmatpush3.bf16.msra.mxu0 %v5465_v15  ;;  %v774_v22 = vand.u32 4294901760, %v773_v16  ;;  %v781_v23 = vand.u32 4294901760, %v780_v17  ;;  %v788_v24 = vand.u32 4294901760, %v787_v18  ;;  %v5477_v40 = vpack.c.bf16 %v780_v17, %v773_v16  ;;  %s6608_s18 = sld [smem:[#allocation24_spill]] }
  0x40   : > { %v6132_v12 = vld [vmem:[%s6121_s1] sm:$0xff]  ;;  %5467 = vmatprep.subr.bf16.mxu0 %v5901_v6  ;;  %v795_v26 = vand.u32 4294901760, %v794_v19  ;;  %v5480_v41 = vpack.c.bf16 %v794_v19, %v787_v18 }
  0x41   : > { %v690_v14 = vsel %vm688_vm2, %v6132_v12, 0  ;;  %v775_v27 = vsub.f32 %v773_v16, %v774_v22  ;;  %v782_v28 = vsub.f32 %v780_v17, %v781_v23  ;;  %v789_v29 = vsub.f32 %v787_v18, %v788_v24 }
  0x42   : > { %v761_v20 = vand.u32 4294901760, %v690_v14  ;;  %v796_v31 = vsub.f32 %v794_v19, %v795_v26  ;;  %v5489_v42 = vpack.c.bf16 %v781_v23, %v774_v22  ;;  %v5492_v43 = vpack.c.bf16 %v795_v26, %v788_v24 }
  0x43   : > { %5469 = vmatpush3.bf16.msra.mxu0 %v5468_v21  ;;  %v776_v32 = vand.u32 4294901760, %v775_v27  ;;  %v783_v33 = vand.u32 4294901760, %v782_v28  ;;  %v790_v36 = vand.u32 4294901760, %v789_v29 }
  0x44   : > { %v762_v25 = vsub.f32 %v690_v14, %v761_v20  ;;  %5470 = vmatprep.subr.bf16.mxu0 %v5901_v6  ;;  %v797_v37 = vand.u32 4294901760, %v796_v31 }
  0x45   : > { %v5471_v35 = vpack.c.bf16 %v783_v33, %v776_v32  ;;  %s6609_s0 = smov %s6608_s18 }
  0x46   : > { %v763_v30 = vand.u32 4294901760, %v762_v25  ;;  %v5474_v39 = vpack.c.bf16 %v797_v37, %v790_v36 }
  0x48   : > { %v764_v34 = vsub.f32 %v762_v25, %v763_v30 }
  0x4a   : > { %v765_v38 = vand.u32 4294901760, %v764_v34 }
  0x4c   : > { %5065 = vmatmul.mubr.f32.vlgmr.msra.gmra.mrb[0].mxu0 %v765_v38 }
  0x4d   : > { %5472 = vmatpush3.bf16.msra.mxu0 %v5471_v35  ;;  %5075 = vmatprep.mubr.msk.f32.mxu0 %vm5902_vm1, %v5903_v11 }
  0x4e   : > { %5473 = vmatprep.subr.bf16.mxu0 %v5901_v6 }
  0x51   : > { %5475 = vmatpush3.bf16.msra.mxu0 %v5474_v39 }
  0x52   : > { %5476 = vmatprep.subr.bf16.mxu0 %v5901_v6 }
  0x54   : > { %5076 = vmatmul.mubr.f32.vlgmr.msra.gmra.mrb[0].mxu0 %v761_v20 }
  0x55   : > { %5478 = vmatpush3.bf16.msra.mxu0 %v5477_v40  ;;  %5086 = vmatprep.mubr.msk.f32.mxu0 %vm5902_vm1, %v5903_v11 }
  0x56   : > { %5479 = vmatprep.subr.bf16.mxu0 %v5901_v6 }
  0x59   : > { %5481 = vmatpush3.bf16.msra.mxu0 %v5480_v41 }
  0x5a   : > { %5482 = vmatprep.subr.bf16.mxu0 %v5901_v6 }
  0x5c   : > { %5087 = vmatmul.mubr.f32.vlgmr.msra.gmra.mrb[0].mxu0 %v762_v25 }
  0x5d   : > { %5484 = vmatpush3.bf16.msra.mxu0 %v5465_v15  ;;  %5097 = vmatprep.mubr.msk.f32.mxu0 %vm5902_vm1, %v5903_v11 }
  0x5e   : > { %5485 = vmatprep.subr.bf16.mxu0 %v5901_v6 }
  0x61   : > { %5487 = vmatpush3.bf16.msra.mxu0 %v5468_v21 }
  0x62   : > { %5488 = vmatprep.subr.bf16.mxu0 %v5901_v6 }
  0x64   : > { %5098 = vmatmul.mubr.f32.vlgmr.msra.gmra.mrb[0].mxu0 %v763_v30 }
  0x65   : > { %5490 = vmatpush3.bf16.msra.mxu0 %v5489_v42  ;;  %5108 = vmatprep.mubr.msk.f32.mxu0 %vm5902_vm1, %v5903_v11 }
  0x66   : > { %5491 = vmatprep.subr.bf16.mxu0 %v5901_v6 }
  0x69   : > { %5493 = vmatpush3.bf16.msra.mxu0 %v5492_v43 }
  0x6a   : > { %5494 = vmatprep.subr.bf16.mxu0 %v5901_v6 }
  0x6c   : > { %5109 = vmatmul.mubr.f32.vlgmr.msra.gmra.mrb[0].mxu0 %v761_v20 }
  0x6d   : > { %5496 = vmatpush3.bf16.msra.mxu0 %v5465_v15  ;;  %5119 = vmatprep.mubr.msk.f32.mxu0 %vm5902_vm1, %v5903_v11 }
  0x6e   : > { %5497 = vmatprep.subr.bf16.mxu0 %v5901_v6 }
  0x71   : > { %5499 = vmatpush3.bf16.msra.mxu0 %v5468_v21 }
  0x72   : > { %5187 = vmatprep.subr.mxu0 %v5903_v11 }
  0x74   : > { %5120 = vmatmul.mubr.f32.vlgmr.msra.gmra.mrb[0].mxu0 %v761_v20 }
  0x75   : > { %5189 = vmatprep.mubr.msk.f32.mxu0 %vm5902_vm1, %v5903_v11 }
 0x147   : > { %v1173_v45 = vpop.f32.mrb[0].mxu0 }
 0x148   : > { %v6168_v46 = vadd.f32 %v4860_v44, %v1173_v45  ;;  %v5121_v47 = vpop.f32.mrb[1].mxu0 }
 0x14a   : > { %1643 = vrot.lane.b32.xlu1 %v6168_v46, %s5904_s23  ;;  %1178 = vrot.lane.b32.xlu0 %v6168_v46, %s5905_s22  ;;  %v1181_v48 = vsel %vm1180_vm3, %v6168_v46, 0  ;;  %s6604_s22 = sld [smem:[#allocation9_spill]] }
 0x14b   : > { %v1251_v49 = vand.u32 4294901760, %v1181_v48 }
 0x14d   : > { %v1252_v50 = vsub.f32 %v1181_v48, %v1251_v49 }
 0x14f   : > { %v1253_v51 = vand.u32 4294901760, %v1252_v50 }
 0x151   : > { %v1254_v54 = vsub.f32 %v1252_v50, %v1253_v51 }
 0x153   : > { %v1255_v57 = vand.u32 4294901760, %v1254_v54 }
 0x1bc   : > { %v1179_v52 = vpop.permute.xlu0 %1178  ;;  %v1644_v61 = vpop.permute.xlu1 %1643 }
 0x1bd   : > { %v1183_v53 = vsel %vm1180_vm3, %v1179_v52, 0  ;;  %v6191_v62 = vand.u32 4294901760, %v1644_v61 }
 0x1be   : > { %v1186_v55 = vand.u32 4294901760, %v1183_v53 }
 0x1bf   : > { %v1727_v19 = vsub.f32 %v1644_v61, %v6191_v62 }
 0x1c0   : > { %v1263_v56 = vsub.f32 %v1183_v53, %v1186_v55  ;;  %5123 = vmatpush3.xpose.msra.mxu1 %v1186_v55 }
 0x1c1   : > { %5127 = vmatprep.subr.mxu1 %v5903_v11  ;;  %v1728_v26 = vand.u32 4294901760, %v1727_v19 }
 0x1c2   : > { %v1264_v58 = vand.u32 4294901760, %v1263_v56 }
 0x1c3   : > { %5125 = vmatmul.mubr.f32.vlgmr.msra.gmra.mrb[0].mxu1 %v1255_v57  ;;  %v1729_v30 = vsub.f32 %v1727_v19, %v1728_v26 }
 0x1c4   : > { %v1265_v59 = vsub.f32 %v1263_v56, %v1264_v58  ;;  %5129 = vmatprep.mubr.msk.f32.mxu1 %vm5902_vm1, %v5903_v11 }
 0x1c5   : > { %v1730_v33 = vand.u32 4294901760, %v1729_v30 }
 0x1c6   : > { %v1266_v60 = vand.u32 4294901760, %v1265_v59 }
 0x1c8   : > { %5128 = vmatpush3.xpose.msra.mxu1 %v1266_v60 }
 0x1c9   : > { %5132 = vmatprep.subr.mxu1 %v5903_v11 }
 0x1cb   : > { %5130 = vmatmul.mubr.f32.vlgmr.msra.gmra.mrb[0].mxu1 %v1251_v49 }
 0x1cc   : > { %5133 = vmatpush3.xpose.msra.mxu1 %v1263_v56  ;;  %5134 = vmatprep.mubr.msk.f32.mxu1 %vm5902_vm1, %v5903_v11 }
 0x1cd   : > { %5137 = vmatprep.subr.mxu1 %v5903_v11 }
 0x1d3   : > { %5135 = vmatmul.mubr.f32.vlgmr.msra.gmra.mrb[0].mxu1 %v1252_v50 }
 0x1d4   : > { %5138 = vmatpush3.xpose.msra.mxu1 %v1186_v55  ;;  %5139 = vmatprep.mubr.msk.f32.mxu1 %vm5902_vm1, %v5903_v11 }
 0x1d5   : > { %5142 = vmatprep.subr.mxu1 %v5903_v11 }
 0x1db   : > { %5140 = vmatmul.mubr.f32.vlgmr.msra.gmra.mrb[0].mxu1 %v1253_v51 }
 0x1dc   : > { %5143 = vmatpush3.xpose.msra.mxu1 %v1264_v58  ;;  %5144 = vmatprep.mubr.msk.f32.mxu1 %vm5902_vm1, %v5903_v11 }
 0x1dd   : > { %5147 = vmatprep.subr.mxu1 %v5903_v11 }
 0x1e3   : > { %5145 = vmatmul.mubr.f32.vlgmr.msra.gmra.mrb[0].mxu1 %v1251_v49 }
 0x1e4   : > { %5148 = vmatpush3.xpose.msra.mxu1 %v1186_v55  ;;  %5149 = vmatprep.mubr.msk.f32.mxu1 %vm5902_vm1, %v5903_v11 }
 0x1e5   : > { %5152 = vmatprep.subr.mxu1 %v5903_v11 }
 0x1eb   : > { %5150 = vmatmul.mubr.f32.vlgmr.msra.gmra.mrb[0].mxu1 %v1251_v49 }
 0x1ec   : > { %5153 = vmatpush3.msra.mxu1 %v6191_v62  ;;  %5154 = vmatprep.mubr.msk.f32.mxu1 %vm5902_vm1, %v5903_v11 }
 0x1ed   : > { %5157 = vmatprep.subr.mxu1 %v5903_v11 }
 0x2be   : > { %v1627_v63 = vpop.f32.mrb[0].mxu1 }
 0x2bf   : > { %v1631_v0 = vmul.f32 0.35355338, %v1627_v63  ;;  %v5151_v1 = vpop.f32.mrb[1].mxu1 }
 0x2c1   : > { %v1632_v2 = vsel %vm1180_vm3, %v1631_v0, -inf }
 0x2c2   : > { %1633 = vmax.xlane.f32.xlu0 %v1632_v2 }
 0x34f   : > { %v1634_v3 = vpop.xlane.xlu0 %1633 }
 0x350   : > { %v1635_v4 = vsub.f32 %v1631_v0, %v1634_v3  ;;  %v3018_v3 = vld [vmem:[%s6084_s24] sm:$0xff] }
 0x352   : > { %v1636_v5 = vmul.f32 1.442695, %v1635_v4  ;;  %v3019_v4 = vld [vmem:[%s6084_s24 + $0x8] sm:$0xff] }
 0x354   : > { %5789 = vpow2.f32 %v1636_v5  ;;  %v3032_v5 = vand.u32 4294901760, %v3018_v3 }
 0x35e   : > { %v5790_v7 = vpop.eup %5789 }
 0x35f   : > { %v1638_v8 = vsel %vm1180_vm3, %v5790_v7, 0.0 }
 0x360   : > { %1639 = vadd.xlane.f32.xlu1 %v1638_v8 }
 0x371   : > { %2097 = vrot.lane.b32.xlu1 %v6168_v46, %s5906_s27 }
 0x375   : > { %2095 = vrot.lane.b32.xlu1 %v6168_v46, %s5907_s28 }
 0x3ed   : > { %v1640_v9 = vpop.xlane.xlu1 %1639 }
 0x3ee   : > { %5791 = vrcp.f32 %v1640_v9  ;;  %v3110_v9 = vsub.f32 %v3018_v3, %v3032_v5 }
 0x3f1   : > { %v2098_v10 = vpop.permute.xlu1 %2097 }
 0x3f2   : > { %v2101_v13 = vsel %vm1180_vm3, %v2098_v10, 0 }
 0x3f3   : > { %v6202_v14 = vand.u32 4294901760, %v2101_v13 }
 0x3f5   : > { %v2181_v15 = vsub.f32 %v2101_v13, %v6202_v14  ;;  %v2096_v18 = vpop.permute.xlu1 %2095  ;;  %v3111_v13 = vand.u32 4294901760, %v3110_v9 }
 0x3f6   : > { %v2099_v23 = vsel %vm1180_vm3, %v2096_v18, 0 }
 0x3f7   : > { %v2182_v16 = vand.u32 4294901760, %v2181_v15  ;;  %v2169_v27 = vand.u32 4294901760, %v2099_v23 }
 0x3f8   : > { %v5792_v17 = vpop.eup %5791 }
 0x3f9   : > { %v1642_v20 = vmul.f32 %v5792_v17, %v5790_v7  ;;  %v2183_v21 = vsub.f32 %v2181_v15, %v2182_v16  ;;  %v2170_v34 = vsub.f32 %v2099_v23, %v2169_v27  ;;  %v3035_v7 = vand.u32 4294901760, %v3019_v4 }
 0x3fb   : > { %v2184_v22 = vand.u32 4294901760, %v2183_v21  ;;  %v1647_v24 = vsel %vm1180_vm3, %v1642_v20, 0  ;;  %v2171_v35 = vand.u32 4294901760, %v2170_v34  ;;  %v5501_v8 = vpack.c.bf16 %v3035_v7, %v3032_v5 }
 0x3fc   : > { %v1715_v25 = vand.u32 4294901760, %v1647_v24  ;;  %v3117_v10 = vsub.f32 %v3019_v4, %v3035_v7 }
 0x3fd   : > { %5188 = vmatpush3.xpose.msra.mxu0 %v2184_v22  ;;  %v2172_v36 = vsub.f32 %v2170_v34, %v2171_v35 }
 0x3fe   : > { %5192 = vmatprep.subr.mxu0 %v5903_v11  ;;  %v1716_v28 = vsub.f32 %v1647_v24, %v1715_v25  ;;  %v5507_v22 = vpack.c.bf16 %v3117_v10, %v3110_v9 }
 0x3ff   : > { %v2173_v37 = vand.u32 4294901760, %v2172_v36 }
 0x400   : > { %5190 = vmatmul.mubr.f32.vlgmr.msra.gmra.mrb[2].mxu0 %v2169_v27  ;;  %v1717_v29 = vand.u32 4294901760, %v1716_v28 }
 0x401   : > { %5193 = vmatpush3.xpose.msra.mxu0 %v2181_v15  ;;  %5194 = vmatprep.mubr.msk.f32.mxu0 %vm5902_vm1, %v5903_v11 }
 0x402   : > { %v1718_v31 = vsub.f32 %v1716_v28, %v1717_v29  ;;  %5197 = vmatprep.subr.mxu0 %v5903_v11 }
 0x404   : > { %v1719_v32 = vand.u32 4294901760, %v1718_v31 }
 0x406   : > { %5155 = vmatmul.mubr.f32.vlgmr.msra.gmra.mrb[2].mxu1 %v1719_v32  ;;  %v4861_v32 = vld [vmem:[%s6601_s17] ss:$0 sm:$0xff]  ;;  %s4869_s17 = sshll.u32 %s6604_s22, 7 }
 0x407   : > { %5158 = vmatpush3.msra.mxu1 %v1730_v33  ;;  %5159 = vmatprep.mubr.msk.f32.mxu1 %vm5902_vm1, %v5903_v11 }
 0x408   : > { %5195 = vmatmul.mubr.f32.vlgmr.msra.gmra.mrb[2].mxu0 %v2170_v34  ;;  %5162 = vmatprep.subr.mxu1 %v5903_v11 }
 0x409   : > { %5198 = vmatpush3.xpose.msra.mxu0 %v6202_v14  ;;  %5199 = vmatprep.mubr.msk.f32.mxu0 %vm5902_vm1, %v5903_v11 }
 0x40a   : > { %5202 = vmatprep.subr.mxu0 %v5903_v11 }
 0x40e   : > { %5160 = vmatmul.mubr.f32.vlgmr.msra.gmra.mrb[2].mxu1 %v1715_v25 }
 0x40f   : > { %5163 = vmatpush3.msra.mxu1 %v1727_v19  ;;  %5164 = vmatprep.mubr.msk.f32.mxu1 %vm5902_vm1, %v5903_v11 }
 0x410   : > { %5200 = vmatmul.mubr.f32.vlgmr.msra.gmra.mrb[2].mxu0 %v2171_v35  ;;  %5167 = vmatprep.subr.mxu1 %v5903_v11 }
 0x411   : > { %5203 = vmatpush3.xpose.msra.mxu0 %v2182_v16  ;;  %5204 = vmatprep.mubr.msk.f32.mxu0 %vm5902_vm1, %v5903_v11  ;;  %v3112_v16 = vsub.f32 %v3110_v9, %v3111_v13 }
 0x412   : > { %5207 = vmatprep.subr.mxu0 %v5903_v11 }
 0x413   : > { %v3113_v19 = vand.u32 4294901760, %v3112_v16 }
 0x416   : > { %5165 = vmatmul.mubr.f32.vlgmr.msra.gmra.mrb[2].mxu1 %v1716_v28 }
 0x417   : > { %5168 = vmatpush3.msra.mxu1 %v6191_v62  ;;  %5169 = vmatprep.mubr.msk.f32.mxu1 %vm5902_vm1, %v5903_v11 }
 0x418   : > { %5205 = vmatmul.mubr.f32.vlgmr.msra.gmra.mrb[2].mxu0 %v2169_v27  ;;  %5172 = vmatprep.subr.mxu1 %v5903_v11 }
 0x419   : > { %5208 = vmatpush3.xpose.msra.mxu0 %v6202_v14  ;;  %5209 = vmatprep.mubr.msk.f32.mxu0 %vm5902_vm1, %v5903_v11 }
 0x41a   : > { %5500 = vmatprep.subr.bf16.mxu0 %v5901_v6 }
 0x41e   : > { %5170 = vmatmul.mubr.f32.vlgmr.msra.gmra.mrb[2].mxu1 %v1717_v29 }
 0x41f   : > { %5173 = vmatpush3.msra.mxu1 %v1728_v26  ;;  %5174 = vmatprep.mubr.msk.f32.mxu1 %vm5902_vm1, %v5903_v11 }
 0x420   : > { %5210 = vmatmul.mubr.f32.vlgmr.msra.gmra.mrb[2].mxu0 %v2169_v27  ;;  %5177 = vmatprep.subr.mxu1 %v5903_v11 }
 0x421   : > { %5246 = vmatprep.mubr.msk.f32.mxu0 %vm5902_vm1, %v5903_v11  ;;  %5502 = vmatpush3.bf16.msra.mxu0 %v5501_v8 }
 0x422   : > { %5503 = vmatprep.subr.bf16.mxu0 %v5901_v6 }
 0x426   : > { %5175 = vmatmul.mubr.f32.vlgmr.msra.gmra.mrb[2].mxu1 %v1715_v25 }
 0x427   : > { %5178 = vmatpush3.msra.mxu1 %v6191_v62  ;;  %5179 = vmatprep.mubr.msk.f32.mxu1 %vm5902_vm1, %v5903_v11 }
 0x428   : > { %5182 = vmatprep.subr.mxu1 %v5903_v11 }
 0x42e   : > { %5180 = vmatmul.mubr.f32.vlgmr.msra.gmra.mrb[2].mxu1 %v1715_v25 }
 0x42f   : > { %5183 = vmatpush3.xpose.msra.mxu1 %v6202_v14  ;;  %5184 = vmatprep.mubr.msk.f32.mxu1 %vm5902_vm1, %v5903_v11  ;;  %v3118_v14 = vand.u32 4294901760, %v3117_v10 }
 0x430   : > { %5212 = vmatprep.subr.mxu1 %v5903_v11 }
 0x431   : > { %v3119_v17 = vsub.f32 %v3117_v10, %v3118_v14  ;;  %v5513_v23 = vpack.c.bf16 %v3118_v14, %v3111_v13 }
 0x432   : > { %5185 = vmatmul.mubr.f32.vlgmr.msra.gmra.mrb[4].mxu1 %v2173_v37 }
 0x433   : > { %5214 = vmatprep.mubr.msk.f32.mxu1 %vm5902_vm1, %v5903_v11  ;;  %v3120_v20 = vand.u32 4294901760, %v3119_v17 }
 0x435   : > { %v5504_v21 = vpack.c.bf16 %v3120_v20, %v3113_v19  ;;  %v4862_v20 = vld [vmem:[%s6602_s30] ss:$0 sm:$0xff] }
 0x4f3   : > { %v2545_v38 = vpop.f32.mrb[2].mxu0 }
 0x4f4   : > { %v5211_v39 = vpop.f32.mrb[3].mxu0 }
 0x4f5   : > { %v3524_v39 = vld [vmem:[%s6097_s25] sm:$0xff] }
 0x501   : > { %v6248_v40 = vpop.f32.mrb[2].mxu1 }
 0x502   : > { %v5181_v41 = vpop.f32.mrb[3].mxu1 }
 0x503   : > { %v3526_v41 = vld [vmem:[%s6097_s25 + $0x10] sm:$0xff] }
 0x505   : > { %v2175_v42 = vpop.f32.mrb[4].mxu1 }
 0x506   : > { %v5627_v43 = vadd.f32 %v2545_v38, %v2175_v42  ;;  %v5186_v44 = vpop.f32.mrb[5].mxu1  ;;  %v3539_v42 = vand.u32 4294901760, %v3524_v39 }
 0x507   : > { %v3527_v44 = vld [vmem:[%s6097_s25 + $0x18] sm:$0xff] }
 0x508   : > { %v2549_v45 = vmul.f32 0.35355338, %v5627_v43 }
 0x50a   : > { %v2550_v47 = vsel %vm1180_vm3, %v2549_v45, -inf }
 0x50b   : > { %2551 = vmax.xlane.f32.xlu1 %v2550_v47  ;;  %v3548_v47 = vand.u32 4294901760, %v3527_v44 }
 0x598   : > { %v2552_v48 = vpop.xlane.xlu1 %2551 }
 0x599   : > { %v2553_v49 = vsub.f32 %v2549_v45, %v2552_v48  ;;  %v3545_v45 = vand.u32 4294901760, %v3526_v41 }
 0x59b   : > { %v2554_v50 = vmul.f32 1.442695, %v2553_v49  ;;  %v3619_v49 = vsub.f32 %v3524_v39, %v3539_v42 }
 0x59d   : > { %5793 = vpow2.f32 %v2554_v50 }
 0x5a7   : > { %v5794_v51 = vpop.eup %5793 }
 0x5a8   : > { %v2556_v52 = vsel %vm1180_vm3, %v5794_v51, 0.0 }
 0x5a9   : > { %2557 = vadd.xlane.f32.xlu0 %v2556_v52  ;;  %v3640_v52 = vsub.f32 %v3527_v44, %v3548_v47  ;;  %v4054_v44 = vld [vmem:[%s6107_s4 + $0x20] sm:$0xff] }
 0x5bf   : > { %2561 = vrot.lane.b32.xlu0 %v6168_v46, %s5908_s21 }
 0x636   : > { %v2558_v53 = vpop.xlane.xlu0 %2557 }
 0x637   : > { %5795 = vrcp.f32 %v2558_v53  ;;  %v6308_v53 = vpack.c.bf16 %v3548_v47, %v3545_v45 }
 0x63a   : > { %v2562_v54 = vpop.permute.xlu0 %2561 }
 0x63b   : > { %v2568_v55 = vand.u32 4294901760, %v2562_v54 }
 0x63d   : > { %5213 = vmatpush3.msra.mxu1 %v2568_v55  ;;  %v2645_v58 = vsub.f32 %v2562_v54, %v2568_v55  ;;  %v3620_v54 = vand.u32 4294901760, %v3619_v49 }
 0x63e   : > { %5217 = vmatprep.subr.mxu1 %v5903_v11 }
 0x63f   : > { %v2646_v61 = vand.u32 4294901760, %v2645_v58 }
 0x641   : > { %v5796_v56 = vpop.eup %5795  ;;  %v2647_v0 = vsub.f32 %v2645_v58, %v2646_v61 }
 0x642   : > { %v2560_v57 = vmul.f32 %v5796_v56, %v5794_v51  ;;  %v3633_v51 = vsub.f32 %v3526_v41, %v3545_v45  ;;  %v3621_v56 = vsub.f32 %v3619_v49, %v3620_v54  ;;  %v4055_v45 = vld [vmem:[%s6107_s4 + $0x28] sm:$0xff] }
 0x643   : > { %v2648_v46 = vand.u32 4294901760, %v2647_v0 }
 0x644   : > { %v2565_v59 = vsel %vm1180_vm3, %v2560_v57, 0  ;;  %v5534_v4 = vpack.c.bf16 %v3640_v52, %v3633_v51 }
 0x645   : > { %v2633_v60 = vand.u32 4294901760, %v2565_v59 }
 0x647   : > { %v2634_v62 = vsub.f32 %v2565_v59, %v2633_v60 }
 0x649   : > { %v2635_v63 = vand.u32 4294901760, %v2634_v62 }
 0x64b   : > { %v2636_v1 = vsub.f32 %v2634_v62, %v2635_v63 }
 0x64d   : > { %v2637_v2 = vand.u32 4294901760, %v2636_v1 }
 0x64f   : > { %5215 = vmatmul.mubr.f32.vlgmr.msra.gmra.mrb[6].mxu1 %v2637_v2 }
 0x650   : > { %5218 = vmatpush3.msra.mxu1 %v2648_v46  ;;  %5219 = vmatprep.mubr.msk.f32.mxu1 %vm5902_vm1, %v5903_v11 }
 0x651   : > { %5222 = vmatprep.subr.mxu1 %v5903_v11 }
 0x657   : > { %5220 = vmatmul.mubr.f32.vlgmr.msra.gmra.mrb[6].mxu1 %v2633_v60 }
 0x658   : > { %5223 = vmatpush3.msra.mxu1 %v2645_v58  ;;  %5224 = vmatprep.mubr.msk.f32.mxu1 %vm5902_vm1, %v5903_v11  ;;  %v3622_v58 = vand.u32 4294901760, %v3621_v56 }
 0x659   : > { %5227 = vmatprep.subr.mxu1 %v5903_v11 }
 0x65f   : > { %5225 = vmatmul.mubr.f32.vlgmr.msra.gmra.mrb[6].mxu1 %v2634_v62 }
 0x660   : > { %5228 = vmatpush3.msra.mxu1 %v2568_v55  ;;  %5229 = vmatprep.mubr.msk.f32.mxu1 %vm5902_vm1, %v5903_v11 }
 0x661   : > { %5232 = vmatprep.subr.mxu1 %v5903_v11 }
 0x667   : > { %5230 = vmatmul.mubr.f32.vlgmr.msra.gmra.mrb[6].mxu1 %v2635_v63 }
 0x668   : > { %5233 = vmatpush3.msra.mxu1 %v2646_v61  ;;  %5234 = vmatprep.mubr.msk.f32.mxu1 %vm5902_vm1, %v5903_v11  ;;  %v3641_v61 = vand.u32 4294901760, %v3640_v52 }
 0x669   : > { %5237 = vmatprep.subr.mxu1 %v5903_v11 }
 0x66a   : > { %v3642_v0 = vsub.f32 %v3640_v52, %v3641_v61 }
 0x66c   : > { %v3643_v2 = vand.u32 4294901760, %v3642_v0 }
 0x66f   : > { %5235 = vmatmul.mubr.f32.vlgmr.msra.gmra.mrb[6].mxu1 %v2633_v60 }
 0x670   : > { %5238 = vmatpush3.msra.mxu1 %v2568_v55  ;;  %5239 = vmatprep.mubr.msk.f32.mxu1 %vm5902_vm1, %v5903_v11 }
 0x671   : > { %5518 = vmatprep.subr.bf16.mxu1 %v5901_v6 }
 0x677   : > { %5240 = vmatmul.mubr.f32.vlgmr.msra.gmra.mrb[6].mxu1 %v2633_v60  ;;  %v3634_v60 = vand.u32 4294901760, %v3633_v51 }
 0x678   : > { %5292 = vmatprep.mubr.msk.f32.mxu1 %vm5902_vm1, %v5903_v11 }
 0x679   : > { %v3635_v63 = vsub.f32 %v3633_v51, %v3634_v60  ;;  %v5546_v7 = vpack.c.bf16 %v3641_v61, %v3634_v60 }
 0x67b   : > { %v3636_v1 = vand.u32 4294901760, %v3635_v63 }
 0x67d   : > { %v5528_v46 = vpack.c.bf16 %v3643_v2, %v3636_v1 }
 0x74a   : > { %v3009_v15 = vpop.f32.mrb[6].mxu1 }
 0x74b   : > { %3014 = vrot.lane.b32.xlu0 %v3009_v15, %s5909_s19  ;;  %v5241_v18 = vpop.f32.mrb[7].mxu1 }
 0x7bd   : > { %v3015_v24 = vpop.permute.xlu0 %3014 }
 0x7be   : > { %v3017_v25 = vsel %vm1180_vm3, %v6248_v40, %v3015_v24  ;;  %v3525_v40 = vld [vmem:[%s6097_s25 + $0x8] sm:$0xff]  ;;  %s4654_s25 = sshll.u32 %s6121_s1, 4  ;;  %s6486_s25 = int_to_ptr.vmem [resolvable:$true] %s4654_s25 }
 0x7bf   : > { %v3029_v26 = vsel %vm3027_vm4, %v3017_v25, 0  ;;  %v3542_v43 = vand.u32 4294901760, %v3525_v40 }
 0x7c0   : > { %v3098_v27 = vand.u32 4294901760, %v3029_v26 }
 0x7c1   : > { %v6305_v48 = vpack.c.bf16 %v3542_v43, %v3539_v42  ;;  %v3626_v50 = vsub.f32 %v3525_v40, %v3542_v43 }
 0x7c2   : > { %v3099_v28 = vsub.f32 %v3029_v26, %v3098_v27 }
 0x7c3   : > { %5520 = vmatpush3.bf16.msra.mxu1 %v6305_v48  ;;  %v3627_v55 = vand.u32 4294901760, %v3626_v50  ;;  %v5531_v3 = vpack.c.bf16 %v3626_v50, %v3619_v49  ;;  %v4085_v49 = vand.u32 4294901760, %v4055_v45 }
 0x7c4   : > { %v3100_v29 = vand.u32 4294901760, %v3099_v28  ;;  %5521 = vmatprep.subr.bf16.mxu1 %v5901_v6 }
 0x7c5   : > { %v3628_v57 = vsub.f32 %v3626_v50, %v3627_v55  ;;  %v5543_v5 = vpack.c.bf16 %v3627_v55, %v3620_v54  ;;  %v4189_v52 = vsub.f32 %v4055_v45, %v4085_v49  ;;  %v4057_v54 = vld [vmem:[%s6107_s4 + $0x38] sm:$0xff] }
 0x7c6   : > { %v3101_v30 = vsub.f32 %v3099_v28, %v3100_v29 }
 0x7c7   : > { %5523 = vmatpush3.bf16.msra.mxu1 %v6308_v53  ;;  %v3629_v59 = vand.u32 4294901760, %v3628_v57  ;;  %v4091_v57 = vand.u32 4294901760, %v4057_v54 }
 0x7c8   : > { %v3102_v31 = vand.u32 4294901760, %v3101_v30  ;;  %5524 = vmatprep.subr.bf16.mxu1 %v5901_v6 }
 0x7c9   : > { %v5525_v62 = vpack.c.bf16 %v3629_v59, %v3622_v58  ;;  %v4203_v60 = vsub.f32 %v4057_v54, %v4091_v57 }
 0x7ca   : > { %5247 = vmatmul.mubr.f32.vlgmr.msra.gmra.mrb[4].mxu0 %v3102_v31 }
 0x7cb   : > { %5505 = vmatpush3.bf16.msra.mxu0 %v5504_v21  ;;  %5253 = vmatprep.mubr.msk.f32.mxu0 %vm5902_vm1, %v5903_v11 }
 0x7cc   : > { %5506 = vmatprep.subr.bf16.mxu0 %v5901_v6 }
 0x7d2   : > { %5254 = vmatmul.mubr.f32.vlgmr.msra.gmra.mrb[4].mxu0 %v3098_v27 }
 0x7d3   : > { %5508 = vmatpush3.bf16.msra.mxu0 %v5507_v22  ;;  %5260 = vmatprep.mubr.msk.f32.mxu0 %vm5902_vm1, %v5903_v11  ;;  %v4863_v22 = vld [vmem:[%s6603_s2] ss:$0 sm:$0xff]  ;;  %s6484_s2 = scalar_lea.hbm %s6608_s18, %s4869_s17 }
 0x7d4   : > { %5509 = vmatprep.subr.bf16.mxu0 %v5901_v6 }
 0x7da   : > { %5261 = vmatmul.mubr.f32.vlgmr.msra.gmra.mrb[4].mxu0 %v3099_v28 }
 0x7db   : > { %5511 = vmatpush3.bf16.msra.mxu0 %v5501_v8  ;;  %5267 = vmatprep.mubr.msk.f32.mxu0 %vm5902_vm1, %v5903_v11 }
 0x7dc   : > { %5512 = vmatprep.subr.bf16.mxu0 %v5901_v6 }
 0x7e2   : > { %5268 = vmatmul.mubr.f32.vlgmr.msra.gmra.mrb[4].mxu0 %v3100_v29 }
 0x7e3   : > { %5514 = vmatpush3.bf16.msra.mxu0 %v5513_v23  ;;  %5274 = vmatprep.mubr.msk.f32.mxu0 %vm5902_vm1, %v5903_v11 }
 0x7e4   : > { %5515 = vmatprep.subr.bf16.mxu0 %v5901_v6 }
 0x7ea   : > { %5275 = vmatmul.mubr.f32.vlgmr.msra.gmra.mrb[4].mxu0 %v3098_v27 }
 0x7eb   : > { %5517 = vmatpush3.bf16.msra.mxu0 %v5501_v8  ;;  %5281 = vmatprep.mubr.msk.f32.mxu0 %vm5902_vm1, %v5903_v11 }
 0x7ec   : > { %5578 = vmatprep.subr.bf16.mxu0 %v5901_v6 }
 0x7f2   : > { %5282 = vmatmul.mubr.f32.vlgmr.msra.gmra.mrb[4].mxu0 %v3098_v27 }
 0x7f3   : > { %5404 = vmatprep.mubr.msk.f32.mxu0 %vm5902_vm1, %v5903_v11 }
 0x8c5   : > { %v3486_v33 = vpop.f32.mrb[4].mxu0 }
 0x8c6   : > { %v5628_v34 = vadd.f32 %v4861_v32, %v3486_v33  ;;  %v5283_v35 = vpop.f32.mrb[5].mxu0  ;;  %v4051_v32 = vld [vmem:[%s6107_s4 + $0x8] sm:$0xff] }
 0x8c8   : > { %v3492_v36 = vsel %vm688_vm2, %v5628_v34, 0.0  ;;  %v3497_v37 = vmul.f32 %v5628_v34, %v5628_v34 }
 0x8c9   : > { %3493 = vadd.xlane.f32.xlu0 %v3492_v36 }
 0x8ca   : > { %v3498_v38 = vsel %vm688_vm2, %v3497_v37, 0.0  ;;  %v4052_v37 = vld [vmem:[%s6107_s4 + $0x10] sm:$0xff] }
 0x8cb   : > { %3499 = vadd.xlane.f32.xlu1 %v3498_v38  ;;  %v4053_v38 = vld [vmem:[%s6107_s4 + $0x18] sm:$0xff]  ;;  %v4076_v40 = vand.u32 4294901760, %v4052_v37 }
 0x8cc   : > { %v4079_v41 = vand.u32 4294901760, %v4053_v38 }
 0x8cd   : > { %v6364_v42 = vsub.f32 %v4052_v37, %v4076_v40 }
 0x8ce   : > { %v6366_v43 = vsub.f32 %v4053_v38, %v4079_v41  ;;  %v6380_v58 = vpack.c.bf16 %v4079_v41, %v4076_v40 }
 0x8d0   : > { %v5582_v47 = vpack.c.bf16 %v6366_v43, %v6364_v42 }
 0x956   : > { %v3494_v8 = vpop.xlane.xlu0 %3493 }
 0x957   : > { %v3496_v9 = vmul.f32 0.03125, %v3494_v8 }
 0x958   : > { %v3500_v10 = vpop.xlane.xlu1 %3499 }
 0x959   : > { %v3502_v13 = vmul.f32 %v3496_v9, %v3496_v9  ;;  %v3501_v14 = vmul.f32 0.03125, %v3500_v10  ;;  %v3505_v18 = vsub.f32 %v5628_v34, %v3496_v9  ;;  %v4073_v34 = vand.u32 4294901760, %v4051_v32 }
 0x95b   : > { %v3503_v15 = vsub.f32 %v3501_v14, %v3502_v13  ;;  %v6358_v36 = vsub.f32 %v4051_v32, %v4073_v34 }
 0x95d   : > { %v3504_v16 = vmax.f32 %v3503_v15, 0.0  ;;  %v4162_v0 = vand.u32 4294901760, %v6358_v36 }
 0x95f   : > { %v3506_v17 = vadd.f32 1e-05, %v3504_v16  ;;  %v4190_v16 = vand.u32 4294901760, %v4189_v52 }
 0x961   : > { %5797 = vrsqrt.f32 %v3506_v17 }
 0x96b   : > { %v5798_v19 = vpop.eup %5797 }
 0x96c   : > { %v3508_v21 = vmul.f32 %v5798_v19, %v3505_v18  ;;  %v4191_v19 = vsub.f32 %v4189_v52, %v4190_v16 }
 0x96e   : > { %v3515_v23 = vmul.f32 %v4862_v20, %v3508_v21  ;;  %v4192_v21 = vand.u32 4294901760, %v4191_v19 }
 0x970   : > { %v3522_v24 = vadd.f32 %v4863_v22, %v3515_v23  ;;  %v4204_v23 = vand.u32 4294901760, %v4203_v60 }
 0x972   : > { %v6324_v25 = vadd.f32 %v3522_v24, %v6132_v12  ;;  %v4050_v12 = vld [vmem:[%s6107_s4] sm:$0xff] }
 0x973   : > { %v4070_v33 = vand.u32 4294901760, %v4050_v12 }
 0x974   : > { %v3536_v26 = vsel %vm688_vm2, %v6324_v25, 0 }
 0x975   : > { %v3607_v27 = vand.u32 4294901760, %v3536_v26  ;;  %v6356_v35 = vsub.f32 %v4050_v12, %v4070_v33  ;;  %v6373_v50 = vpack.c.bf16 %v4073_v34, %v4070_v33  ;;  %v4864_v34 = vld [vmem:[%s652_s16] ss:$0 sm:$0xff] }
 0x977   : > { %v3608_v28 = vsub.f32 %v3536_v26, %v3607_v27  ;;  %v5579_v39 = vpack.c.bf16 %v6358_v36, %v6356_v35  ;;  %v4155_v63 = vand.u32 4294901760, %v6356_v35 }
 0x979   : > { %v3609_v29 = vand.u32 4294901760, %v3608_v28  ;;  %5580 = vmatpush3.bf16.msra.mxu0 %v5579_v39  ;;  %v4156_v2 = vsub.f32 %v6356_v35, %v4155_v63 }
 0x97a   : > { %5581 = vmatprep.subr.bf16.mxu0 %v5901_v6 }
 0x97b   : > { %v3610_v30 = vsub.f32 %v3608_v28, %v3609_v29 }
 0x97d   : > { %v3611_v31 = vand.u32 4294901760, %v3610_v30  ;;  %5583 = vmatpush3.bf16.msra.mxu0 %v5582_v47 }
 0x97e   : > { %5584 = vmatprep.subr.bf16.mxu0 %v5901_v6 }
 0x97f   : > { %5293 = vmatmul.mubr.f32.vlgmr.msra.gmra.mrb[8].mxu1 %v3611_v31 }
 0x980   : > { %5526 = vmatpush3.bf16.msra.mxu1 %v5525_v62  ;;  %5303 = vmatprep.mubr.msk.f32.mxu1 %vm5902_vm1, %v5903_v11 }
 0x981   : > { %5527 = vmatprep.subr.bf16.mxu1 %v5901_v6 }
 0x984   : > { %5529 = vmatpush3.bf16.msra.mxu1 %v5528_v46  ;;  %v4163_v46 = vsub.f32 %v6358_v36, %v4162_v0 }
 0x985   : > { %5530 = vmatprep.subr.bf16.mxu1 %v5901_v6 }
 0x987   : > { %5304 = vmatmul.mubr.f32.vlgmr.msra.gmra.mrb[8].mxu1 %v3607_v27 }
 0x988   : > { %5532 = vmatpush3.bf16.msra.mxu1 %v5531_v3  ;;  %5314 = vmatprep.mubr.msk.f32.mxu1 %vm5902_vm1, %v5903_v11  ;;  %v4157_v3 = vand.u32 4294901760, %v4156_v2 }
 0x989   : > { %5533 = vmatprep.subr.bf16.mxu1 %v5901_v6 }
 0x98c   : > { %5535 = vmatpush3.bf16.msra.mxu1 %v5534_v4  ;;  %v4164_v4 = vand.u32 4294901760, %v4163_v46 }
 0x98d   : > { %5536 = vmatprep.subr.bf16.mxu1 %v5901_v6 }
 0x98e   : > { %v6400_v8 = vpack.c.bf16 %v4164_v4, %v4157_v3 }
 0x98f   : > { %5315 = vmatmul.mubr.f32.vlgmr.msra.gmra.mrb[8].mxu1 %v3608_v28  ;;  %v6408_v28 = vpack.c.bf16 %v4162_v0, %v4155_v63 }
 0x990   : > { %5538 = vmatpush3.bf16.msra.mxu1 %v6305_v48  ;;  %5325 = vmatprep.mubr.msk.f32.mxu1 %vm5902_vm1, %v5903_v11 }
 0x991   : > { %5539 = vmatprep.subr.bf16.mxu1 %v5901_v6 }
 0x994   : > { %5541 = vmatpush3.bf16.msra.mxu1 %v6308_v53 }
 0x995   : > { %5542 = vmatprep.subr.bf16.mxu1 %v5901_v6 }
 0x997   : > { %5326 = vmatmul.mubr.f32.vlgmr.msra.gmra.mrb[8].mxu1 %v3609_v29 }
 0x998   : > { %5544 = vmatpush3.bf16.msra.mxu1 %v5543_v5  ;;  %5336 = vmatprep.mubr.msk.f32.mxu1 %vm5902_vm1, %v5903_v11  ;;  %v4169_v5 = vand.u32 4294901760, %v6364_v42 }
 0x999   : > { %5545 = vmatprep.subr.bf16.mxu1 %v5901_v6 }
 0x99a   : > { %v4170_v9 = vsub.f32 %v6364_v42, %v4169_v5 }
 0x99c   : > { %5547 = vmatpush3.bf16.msra.mxu1 %v5546_v7  ;;  %v4176_v7 = vand.u32 4294901760, %v6366_v43  ;;  %v4171_v13 = vand.u32 4294901760, %v4170_v9 }
 0x99d   : > { %5548 = vmatprep.subr.bf16.mxu1 %v5901_v6 }
 0x99e   : > { %v4177_v10 = vsub.f32 %v6366_v43, %v4176_v7  ;;  %v6412_v12 = vpack.c.bf16 %v4176_v7, %v4169_v5 }
 0x99f   : > { %5337 = vmatmul.mubr.f32.vlgmr.msra.gmra.mrb[8].mxu1 %v3607_v27 }
 0x9a0   : > { %5550 = vmatpush3.bf16.msra.mxu1 %v6305_v48  ;;  %5347 = vmatprep.mubr.msk.f32.mxu1 %vm5902_vm1, %v5903_v11  ;;  %v4082_v48 = vand.u32 4294901760, %v4054_v44  ;;  %v4178_v14 = vand.u32 4294901760, %v4177_v10 }
 0x9a1   : > { %5551 = vmatprep.subr.bf16.mxu1 %v5901_v6 }
 0x9a2   : > { %v4182_v51 = vsub.f32 %v4054_v44, %v4082_v48  ;;  %v6385_v62 = vpack.c.bf16 %v4085_v49, %v4082_v48  ;;  %v6404_v17 = vpack.c.bf16 %v4178_v14, %v4171_v13 }
 0x9a4   : > { %5553 = vmatpush3.bf16.msra.mxu1 %v6308_v53  ;;  %v4056_v53 = vld [vmem:[%s6107_s4 + $0x30] sm:$0xff]  ;;  %v5585_v55 = vpack.c.bf16 %v4189_v52, %v4182_v51  ;;  %v4183_v15 = vand.u32 4294901760, %v4182_v51  ;;  %s5911_s4 = smov [#allocation2]  }
 0x9a5   : > { %5554 = vmatprep.subr.bf16.mxu1 %v5901_v6  ;;  %v4088_v56 = vand.u32 4294901760, %v4056_v53  ;;  %s5809_s29 = sshll.u32 %s5911_s4, 4  ;;  %s5810_s29 = int_to_ptr.vmem [resolvable:$false] %s5809_s29 }
 0x9a6   : > { %5586 = vmatpush3.bf16.msra.mxu0 %v5585_v55  ;;  %v4184_v18 = vsub.f32 %v4182_v51, %v4183_v15  ;;  %v6414_v32 = vpack.c.bf16 %v4190_v16, %v4183_v15  ;;  %s5811_s16 = scalar_lea.vmem %s5810_s29, 256  ;;  %p5812_p5 = scmp.lt.s32.totalorder %s6486_s25, %s5810_s29 }
 0x9a7   : > { %5348 = vmatmul.mubr.f32.vlgmr.msra.gmra.mrb[8].mxu1 %v3607_v27  ;;  %v4196_v59 = vsub.f32 %v4056_v53, %v4088_v56  ;;  %5587 = vmatprep.subr.bf16.mxu0 %v5901_v6  ;;  %v6392_v1 = vpack.c.bf16 %v4091_v57, %v4088_v56  ;;  %v4205_v27 = vsub.f32 %v4203_v60, %v4204_v23 }
 0x9a8   : > { %5366 = vmatprep.mubr.msk.f32.mxu1 %vm5902_vm1, %v5903_v11  ;;  %5556 = vmatpush3.bf16.msra.mxu1 %v6373_v50  ;;  %v4185_v20 = vand.u32 4294901760, %v4184_v18 }
 0x9a9   : > { %5557 = vmatprep.subr.bf16.mxu1 %v5901_v6  ;;  %v5588_v61 = vpack.c.bf16 %v4203_v60, %v4196_v59  ;;  %v4197_v22 = vand.u32 4294901760, %v4196_v59  ;;  %v4206_v30 = vand.u32 4294901760, %v4205_v27 }
 0x9aa   : > { %v6406_v24 = vpack.c.bf16 %v4192_v21, %v4185_v20 }
 0x9ab   : > { %5589 = vmatpush3.bf16.msra.mxu0 %v5588_v61  ;;  %v4198_v26 = vsub.f32 %v4196_v59, %v4197_v22  ;;  %v6416_v33 = vpack.c.bf16 %v4204_v23, %v4197_v22  ;;  %v5910_v61 = vmov -1.0  }
 0x9ac   : > { %5559 = vmatpush3.bf16.msra.mxu1 %v6380_v58  ;;  %5590 = vmatprep.subr.bf16.mxu0 %v5901_v6 }
 0x9ad   : > { %5560 = vmatprep.subr.bf16.mxu1 %v5901_v6  ;;  %v4199_v29 = vand.u32 4294901760, %v4198_v26 }
 0x9af   : > { %v6410_v31 = vpack.c.bf16 %v4206_v30, %v4199_v29  ;;  %v4867_v30 = vld [vmem:[%s666_s8] ss:$0 sm:$0xff] }
 0x9b0   : > { %5562 = vmatpush3.bf16.msra.mxu1 %v6385_v62 }
 0x9b1   : > { %5563 = vmatprep.subr.bf16.mxu1 %v5901_v6 }
 0x9b4   : > { %5565 = vmatpush3.bf16.msra.mxu1 %v6392_v1 }
 0x9b5   : > { %5566 = vmatprep.subr.bf16.mxu1 %v5901_v6 }
 0xa7a   : > { %v4019_v35 = vpop.f32.mrb[8].mxu1 }
 0xa7b   : > { %v5629_v36 = vadd.f32 %v4864_v34, %v4019_v35  ;;  %v5349_v37 = vpop.f32.mrb[9].mxu1 }
 0xa7d   : > { %v4024_v38 = vmul.f32 0.70710677, %v5629_v36  ;;  %v4023_v2 = vmul.f32 0.5, %v5629_v36 }
 0xa7f   : > { %v4027_v39 = vand.u32 2147483647, %v4024_v38  ;;  %vm4025_vm5 = vcmp.ge.f32.partialorder %v4024_v38, 0.0 }
 0xa80   : > { %v4026_v63 = vsel %vm4025_vm5, 1.0, %v5910_v61 }
 0xa81   : > { %v4028_v40 = vmul.f32 0.3275911, %v4027_v39  ;;  %v4041_v42 = vsub.f32 0.0, %v4027_v39 }
 0xa83   : > { %v4029_v41 = vadd.f32 1.0, %v4028_v40  ;;  %v4042_v44 = vmul.f32 %v4041_v42, %v4027_v39 }
 0xa85   : > { %5799 = vrcp.f32 %v4029_v41  ;;  %v4043_v48 = vmul.f32 1.442695, %v4042_v44 }
 0xa87   : > { %5801 = vpow2.f32 %v4043_v48 }
 0xa8f   : > { %v5800_v43 = vpop.eup %5799 }
 0xa90   : > { %v4032_v45 = vmul.f32 1.0614054, %v5800_v43 }
 0xa91   : > { %v5802_v57 = vpop.eup %5801 }
 0xa92   : > { %v4033_v47 = vadd.f32 -1.4531521, %v4032_v45 }
 0xa94   : > { %v4034_v49 = vmul.f32 %v5800_v43, %v4033_v47 }
 0xa96   : > { %v4035_v51 = vadd.f32 1.4214138, %v4034_v49 }
 0xa98   : > { %v4036_v52 = vmul.f32 %v5800_v43, %v4035_v51 }
 0xa9a   : > { %v4037_v53 = vadd.f32 -0.28449672, %v4036_v52 }
 0xa9c   : > { %v4038_v54 = vmul.f32 %v5800_v43, %v4037_v53 }
 0xa9e   : > { %v4039_v55 = vadd.f32 0.2548296, %v4038_v54 }
 0xaa0   : > { %v4040_v56 = vmul.f32 %v5800_v43, %v4039_v55 }
 0xaa2   : > { %v4045_v59 = vmul.f32 %v5802_v57, %v4040_v56 }
 0xaa4   : > { %v4046_v60 = vsub.f32 1.0, %v4045_v59 }
 0xaa6   : > { %v4047_v0 = vmul.f32 %v4046_v60, %v4026_v63 }
 0xaa8   : > { %v4048_v46 = vadd.f32 1.0, %v4047_v0 }
 0xaaa   : > { %v4049_v3 = vmul.f32 %v4048_v46, %v4023_v2 }
 0xaac   : > { %v4067_v4 = vsel %vm4065_vm6, %v4049_v3, 0 }
 0xaad   : > { %v4142_v5 = vand.u32 4294901760, %v4067_v4 }
 0xaaf   : > { %v4143_v7 = vsub.f32 %v4067_v4, %v4142_v5 }
 0xab1   : > { %5405 = vmatmul.mubr.f32.vlgmr.msra.gmra.mrb[6].mxu0 %v4143_v7  ;;  %v4144_v9 = vand.u32 4294901760, %v4143_v7 }
 0xab2   : > { %5592 = vmatpush3.bf16.msra.mxu0 %v6373_v50  ;;  %5423 = vmatprep.mubr.msk.f32.mxu0 %vm5902_vm1, %v5903_v11 }
 0xab3   : > { %5593 = vmatprep.subr.bf16.mxu0 %v5901_v6  ;;  %v4145_v10 = vsub.f32 %v4143_v7, %v4144_v9 }
 0xab5   : > { %v4146_v13 = vand.u32 4294901760, %v4145_v10 }
 0xab6   : > { %5595 = vmatpush3.bf16.msra.mxu0 %v6380_v58 }
 0xab7   : > { %5367 = vmatmul.mubr.f32.vlgmr.msra.gmra.mrb[10].mxu1 %v4146_v13  ;;  %5596 = vmatprep.subr.bf16.mxu0 %v5901_v6 }
 0xab8   : > { %5568 = vmatpush3.bf16.msra.mxu1 %v6400_v8  ;;  %5385 = vmatprep.mubr.msk.f32.mxu1 %vm5902_vm1, %v5903_v11 }
 0xab9   : > { %5569 = vmatprep.subr.bf16.mxu1 %v5901_v6 }
 0xaba   : > { %5598 = vmatpush3.bf16.msra.mxu0 %v6385_v62 }
 0xabb   : > { %5599 = vmatprep.subr.bf16.mxu0 %v5901_v6 }
 0xabc   : > { %5571 = vmatpush3.bf16.msra.mxu1 %v6404_v17 }
 0xabd   : > { %5572 = vmatprep.subr.bf16.mxu1 %v5901_v6 }
 0xabe   : > { %5601 = vmatpush3.bf16.msra.mxu0 %v6392_v1 }
 0xabf   : > { %5602 = vmatprep.subr.bf16.mxu0 %v5901_v6 }
 0xac0   : > { %5574 = vmatpush3.bf16.msra.mxu1 %v6406_v24 }
 0xac1   : > { %5424 = vmatmul.mubr.f32.vlgmr.msra.gmra.mrb[6].mxu0 %v4144_v9  ;;  %5575 = vmatprep.subr.bf16.mxu1 %v5901_v6 }
 0xac2   : > { %5604 = vmatpush3.bf16.msra.mxu0 %v6408_v28  ;;  %5442 = vmatprep.mubr.msk.f32.mxu0 %vm5902_vm1, %v5903_v11  ;;  %v4866_v28 = vld [vmem:[%s663_s14] ss:$0 sm:$0xff]  ;;  %s5805_s14 = scalar_lea.vmem %s6486_s25, 128 }
 0xac3   : > { %5605 = vmatprep.subr.bf16.mxu0 %v5901_v6  ;;  %p5806_p1 = scmp.ne.s32.totalorder %s6486_s25, %s5805_s14  ;;  %p5813_p6 = scmp.lt.s32.totalorder %s5811_s16, %s5805_s14 }
 0xac4   : > { %5577 = vmatpush3.bf16.msra.mxu1 %v6410_v31 }
 0xac5   : > { %p5807_p2 = pnand %p5806_p1, %p6036_p3  ;;  %p5814_p7 = por %p5813_p6, %p5812_p5 }
 0xac6   : > { %5607 = vmatpush3.bf16.msra.mxu0 %v6412_v12 }
 0xac7   : > { %5386 = vmatmul.mubr.f32.vlgmr.msra.gmra.mrb[10].mxu1 %v4142_v5  ;;  %5608 = vmatprep.subr.bf16.mxu0 %v5901_v6  ;;  %p5808_p4 = pneg %p5807_p2 }
 0xac9   : > { %p5815_p8 = pnand %p5814_p7, %p5808_p4 }
 0xaca   : > { %5610 = vmatpush3.bf16.msra.mxu0 %v6414_v32 }
 0xacb   : > { %5611 = vmatprep.subr.bf16.mxu0 %v5901_v6 }
 0xace   : > { %5613 = vmatpush3.bf16.msra.mxu0 %v6416_v33 }
 0xacf   : > { %5614 = vmatprep.subr.bf16.mxu0 %v5901_v6 }
 0xad1   : > { %5443 = vmatmul.mubr.f32.vlgmr.msra.gmra.mrb[6].mxu0 %v4142_v5 }
 0xad2   : > { %5616 = vmatpush3.bf16.msra.mxu0 %v6373_v50  ;;  %5461 = vmatprep.mubr.msk.f32.mxu0 %vm5902_vm1, %v5903_v11  ;;  %v4865_v11 = vld [vmem:[%s660_s15] ss:$0 sm:$0xff]  ;;  %s6605_s15 = sld [smem:[#allocation6_spill]] }
 0xad3   : > { %5617 = vmatprep.subr.bf16.mxu0 %v5901_v6 }
 0xad6   : > { %5619 = vmatpush3.bf16.msra.mxu0 %v6380_v58 }
 0xad7   : > { %5620 = vmatprep.subr.bf16.mxu0 %v5901_v6 }
 0xad8   : > { %s6610_s26 = sand.u32 1, %s6605_s15  }
 0xad9   : > { %s4641_s8 = scalar_lea.sflag [#allocation3], %s6610_s26 }
 0xada   : > { %5622 = vmatpush3.bf16.msra.mxu0 %v6385_v62 }
 0xadb   : > { %5623 = vmatprep.subr.bf16.mxu0 %v5901_v6 }
 0xade   : > { %5625 = vmatpush3.bf16.msra.mxu0 %v6392_v1 }
 0xae1   : > { %5462 = vmatmul.mubr.f32.vlgmr.msra.gmra.mrb[6].mxu0 %v4142_v5 }
 0xb9a   : > { %v4259_v8 = vpop.f32.mrb[10].mxu1 }
 0xb9b   : > { %v5387_v14 = vpop.f32.mrb[11].mxu1  ;;  %v5630_v50 = vadd.f32 %v4865_v11, %v4259_v8 }
 0xbb4   : > { %v4602_v15 = vpop.f32.mrb[6].mxu0 }
 0xbb5   : > { %v5631_v16 = vadd.f32 %v5630_v50, %v4602_v15  ;;  %v5463_v58 = vpop.f32.mrb[7].mxu0 }
 0xbb7   : > { %v4608_v17 = vsel %vm688_vm2, %v5631_v16, 0.0  ;;  %v4612_v62 = vmul.f32 %v5631_v16, %v5631_v16 }
 0xbb8   : > { %4609 = vadd.xlane.f32.xlu1 %v4608_v17 }
 0xbb9   : > { %v4613_v6 = vsel %vm688_vm2, %v4612_v62, 0.0 }
 0xbbc   : > { %4614 = vadd.xlane.f32.xlu1 %v4613_v6 }
 0xc45   : > { %v4610_v1 = vpop.xlane.xlu1 %4609 }
 0xc46   : > { %v4611_v18 = vmul.f32 0.03125, %v4610_v1 }
 0xc48   : > { %v4617_v20 = vmul.f32 %v4611_v18, %v4611_v18  ;;  %v4620_v26 = vsub.f32 %v5631_v16, %v4611_v18 }
 0xc49   : > { %v4615_v19 = vpop.xlane.xlu1 %4614 }
 0xc4a   : > { %v4616_v21 = vmul.f32 0.03125, %v4615_v19 }
 0xc4c   : > { %v4618_v22 = vsub.f32 %v4616_v21, %v4617_v20 }
 0xc4e   : > { %v4619_v23 = vmax.f32 %v4618_v22, 0.0 }
 0xc50   : > { %v4621_v24 = vadd.f32 1e-05, %v4619_v23 }
 0xc52   : > { %5803 = vrsqrt.f32 %v4621_v24 }
 0xc5c   : > { %v5804_v27 = vpop.eup %5803 }
 0xc5d   : > { %v4623_v29 = vmul.f32 %v5804_v27, %v4620_v26 }
 0xc5f   : > { %v4630_v31 = vmul.f32 %v4866_v28, %v4623_v29 }
 0xc61   : > { %v4637_v12 = vadd.f32 %v4867_v30, %v4630_v31 }
 0xc63   : > { %v4638_v32 = vadd.f32 %v4637_v12, %v6324_v25 }
 0xc65   : > { %4639 = vst.msk [vmem:[%s6121_s1] sm:$0xff] %vm688_vm2, %v4638_v32 }
 0xc66   : > { %5818 = shalt.err (!%p5815_p8)
}
 0xc67   : > { %s5819_s1 = scalar_lea.hbm %s6484_s2, 128  ;;  %s5823_s15 = scalar_lea.hbm %s6609_s0, 256 }
 0xc68   : > { %p5820_p10 = scmp.ne.s32.totalorder %s6484_s2, %s5819_s1  ;;  %p5824_p13 = scmp.lt.u32.totalorder %s6484_s2, %s6609_s0 }
 0xc69   : > { %p5825_p0 = scmp.lt.u32.totalorder %s5823_s15, %s5819_s1  ;;  %p5827_p2 = scmp.lt.u32.totalorder %s5819_s1, %s6484_s2 }
 0xc6a   : > { %p5821_p11 = pnand %p5820_p10, %p6036_p3 }
 0xc6b   : > { %p5826_p1 = por %p5825_p0, %p5824_p13 }
 0xc6c   : > { %p5822_p12 = pneg %p5821_p11 }
 0xc6d   : > { %p5828_p4 = por %p5827_p2, %p5826_p1 }
 0xc6f   : > { %p5829_p5 = pnand %p5828_p4, %p5822_p12 }
 0xc71   : > { %5832 = shalt.err (!%p5829_p5)
}
 0xc72   : > { %5708 = dma.vmem_to_hbm [thread:$0]  (%p6036_p3), %s6486_s25, 128, %s6484_s2, %s4641_s8  }
 0xc73 PF: > { %s6611_s19 = sld [smem:[#allocation12_spill]]  ;;  %s6612_s24 = sld [smem:[#allocation5_spill]] }
 0xc79   : > { %p5714_p6 = scmp.ge.s32.totalorder %s6611_s19, 2  ;;  %s4666_s17 = sand.u32 1, %s6612_s24  }
 0xc7a   : > { %s4667_s13 = scalar_lea.sflag [#allocation3], %s4666_s17 }
 0xc7b   : > { %p5711_p7 = pnand %p5714_p6, %p6046_p9 }
 0xc7d   : > { %5866 = dma.done.wait (!%p5711_p7), %s4667_s13, 128  }
 0xc7e   : > { %5868 = vsyncadd (!%p5711_p7), %s4667_s13, 4294967168  ;;  %s27_s20 = sadd.s32 1, %s6611_s19   ;;  %s6614_s29 = sld [smem:[#allocation6_spill]] }
 0xc7f   : > { %p24_p8 = scmp.ge.s32.totalorder %s27_s20, 6   ;;  %s6615_s30 = sld [smem:[#allocation7_spill]] }
 0xc80   : > { %s6616_s15 = sld [smem:[#allocation17_spill]]  ;;  %s6617_s16 = sld [smem:[#allocation10_spill]] }
 0xc81   : > { %s6618_s17 = sld [smem:[#allocation11_spill]]  ;;  %s6619_s18 = sld [smem:[#allocation13_spill]] }
 0xc82   : > { %s6620_s19 = sld [smem:[#allocation15_spill]]  ;;  %26 = sbr.rel (!%p24_p8) target bundleno = 13 (0xd), region = 151 }
 0xc89   :  { %4672 = vsyncpa [#allocation3], 1 }
 0xc8a   :  { %4674 = vsyncpa [#allocation3 + $0x1], 1 }

</bundles_post_ra>
